<compile_context>
chip_gen: v7x
topology: tpu7x:2x2x1
jax: 0.10.0
libtpu: 0.0.40
codegen_flags: <defaults>
</compile_context>

<pallas_src>
import functools
import math

import jax
import jax.numpy as jnp
from jax import lax
from jax.experimental import pallas as pl
from jax.experimental.pallas import tpu as pltpu


# ----------------------------- kernel helpers ------------------------------

def _layernorm(x, w, b, eps=1e-5):
    mu = jnp.mean(x, axis=-1, keepdims=True)
    var = jnp.mean((x - mu) ** 2, axis=-1, keepdims=True)
    return (x - mu) * lax.rsqrt(var + eps) * w + b


# -------------------- fused transformer stack (one kernel) -----------------

def _encoder_stack_kernel(x_ref, pos_ref, onehot_ref, vecs_ref,
                          wqkv_ref, wo_ref, w1_ref, w2_ref,
                          lnfw_ref, lnfb_ref, proj_ref,
                          o_ref, acc_ref, *, n_heads, mlp_chunks):
    l = pl.program_id(1)
    n_layers = pl.num_programs(1)

    Bt, L, D = acc_ref.shape
    H = n_heads
    hd = D // H
    Dh = w1_ref.shape[-1]
    scale = 1.0 / math.sqrt(hd)

    # Layer 0: bring the residual stream into VMEM and fold in the positional add.
    @pl.when(l == 0)
    def _():
        acc_ref[...] = x_ref[...] + pos_ref[...]

    x = acc_ref[...]                                   # (Bt, L, D) f32, VMEM-resident

    # Packed per-layer vectors: one DMA instead of eight.
    vecs = vecs_ref[0]                                 # (8, Vmax) f32
    ln1w, ln1b = vecs[0:1, :D], vecs[1:2, :D]
    ln2w, ln2b = vecs[2:3, :D], vecs[3:4, :D]
    bo, b2 = vecs[4:5, :D], vecs[5:6, :D]
    bqkv = vecs[6:7, :3 * D]
    b1 = vecs[7:8, :Dh]

    # ---------- attention sub-block: pre-LN, causal multi-head attention ----------
    h = _layernorm(x, ln1w, ln1b)                      # f32 statistics
    h2d = h.reshape(Bt * L, D).astype(jnp.bfloat16)
    qkv = jnp.dot(h2d, wqkv_ref[0],
                  preferred_element_type=jnp.float32) + bqkv      # (Bt*L, 3D) f32
    q = qkv[:, :D].reshape(Bt, L, D)
    k = qkv[:, D:2 * D].reshape(Bt, L, D)
    v = qkv[:, 2 * D:].reshape(Bt, L, D)

    row = lax.broadcasted_iota(jnp.int32, (L, L), 0)
    col = lax.broadcasted_iota(jnp.int32, (L, L), 1)
    causal = (col <= row)[None]                        # (1, L, L)

    # TODO(synk): batch the score/PV einsums over a head-major layout to avoid the
    # per-head (possibly 64-lane-offset) slices; kept per-head here for robustness.
    head_outs = []
    for hh in range(H):                                # H is small & static
        sl = slice(hh * hd, (hh + 1) * hd)
        qh = q[:, :, sl].astype(jnp.bfloat16)
        kh = k[:, :, sl].astype(jnp.bfloat16)
        vh = v[:, :, sl].astype(jnp.bfloat16)
        s = jnp.einsum('bld,bmd->blm', qh, kh,
                       preferred_element_type=jnp.float32) * scale   # (Bt, L, L) f32
        s = jnp.where(causal, s, -1e30)
        s = s - jnp.max(s, axis=-1, keepdims=True)
        p = jnp.exp(s)
        p = p * pl.reciprocal(jnp.sum(p, axis=-1, keepdims=True), approx=True)
        head_outs.append(jnp.einsum('blm,bmd->bld', p.astype(jnp.bfloat16), vh,
                                    preferred_element_type=jnp.float32))
    # single D-wide out-projection (full MXU contraction, no repeated f32 adds)
    attn = jnp.concatenate(head_outs, axis=-1)                         # (Bt, L, D)
    attn2d = jnp.dot(attn.reshape(Bt * L, D).astype(jnp.bfloat16), wo_ref[0],
                     preferred_element_type=jnp.float32) + bo
    x = x + attn2d.reshape(Bt, L, D)

    # ------------------- MLP sub-block: pre-LN, QuickGELU -------------------
    h = _layernorm(x, ln2w, ln2b)
    h2d = h.reshape(Bt * L, D).astype(jnp.bfloat16)
    chunk = Dh // mlp_chunks

    def mlp_chunk_out(c):
        c0 = c * chunk
        h1 = jnp.dot(h2d, w1_ref[0, :, c0:c0 + chunk],
                     preferred_element_type=jnp.float32) + b1[:, c0:c0 + chunk]
        h1 = h1 * jax.nn.sigmoid(1.702 * h1)           # QuickGELU (f32)
        return jnp.dot(h1.astype(jnp.bfloat16), w2_ref[0, c0:c0 + chunk, :],
                       preferred_element_type=jnp.float32)

    mlp_out = mlp_chunk_out(0)
    for c in range(1, mlp_chunks):
        mlp_out = mlp_out + mlp_chunk_out(c)
    x = x + (mlp_out + b2).reshape(Bt, L, D)

    acc_ref[...] = x

    # ------ last-layer epilogue: EOT gather + ln_final + text_projection ------
    @pl.when(l == n_layers - 1)
    def _():
        x_eot = jnp.sum(x * onehot_ref[...], axis=1)               # (Bt, D) f32
        hf = _layernorm(x_eot, lnfw_ref[...], lnfb_ref[...])
        out = jnp.dot(hf.astype(jnp.bfloat16), proj_ref[...],
                      preferred_element_type=jnp.float32)          # (Bt, E) f32
        o_ref[...] = out.reshape(Bt, 1, -1).astype(o_ref.dtype)


def encoder_stack(x, pos, onehot_eot, stacked, lnf_w, lnf_b, text_projection, *,
                  n_heads, block_b, mlp_chunks, vmem_limit_bytes):
    B, L, D = x.shape
    n_layers, _, Dh = stacked["w1"].shape
    E = text_projection.shape[-1]
    vmax = stacked["vecs"].shape[-1]
    assert B % block_b == 0, "padded batch must be a multiple of block_b"

    kernel = functools.partial(_encoder_stack_kernel,
                               n_heads=n_heads, mlp_chunks=mlp_chunks)

    def layer_spec(*tail):
        return pl.BlockSpec((1,) + tail, lambda b, l: (l,) + (0,) * len(tail))

    out = pl.pallas_call(
        kernel,
        out_shape=jax.ShapeDtypeStruct((B, 1, E), jnp.float32),
        grid=(B // block_b, n_layers),
        in_specs=[
            pl.BlockSpec((block_b, L, D), lambda b, l: (b, 0, 0)),   # embeddings
            pl.BlockSpec((1, L, D), lambda b, l: (0, 0, 0)),         # positional emb
            pl.BlockSpec((block_b, L, 1), lambda b, l: (b, 0, 0)),   # EOT one-hot
            layer_spec(8, vmax),      # packed per-layer vectors (ln w/b + biases)
            layer_spec(D, 3 * D),     # wqkv (bf16)
            layer_spec(D, D),         # wo   (bf16)
            layer_spec(D, Dh),        # w1   (bf16)
            layer_spec(Dh, D),        # w2   (bf16)
            pl.BlockSpec((1, D), lambda b, l: (0, 0)),               # ln_final w
            pl.BlockSpec((1, D), lambda b, l: (0, 0)),               # ln_final b
            pl.BlockSpec((D, E), lambda b, l: (0, 0)),               # text_projection
        ],
        out_specs=pl.BlockSpec((block_b, 1, E), lambda b, l: (b, 0, 0)),
        scratch_shapes=[pltpu.VMEM((block_b, L, D), jnp.float32)],   # residual stream
        compiler_params=pltpu.CompilerParams(
            dimension_semantics=("parallel", "arbitrary"),
            vmem_limit_bytes=vmem_limit_bytes),
    )(x, pos.reshape(1, L, D), onehot_eot,
      stacked["vecs"], stacked["wqkv"], stacked["wo"], stacked["w1"], stacked["w2"],
      lnf_w.reshape(1, D), lnf_b.reshape(1, D), text_projection)
    return out.reshape(B, E)


# ------------------------------ tiling plan ---------------------------------

def _vmem_budget_bytes():
    """Usable scoped-VMEM budget (≈115 MiB on v5e/v6e 128 MiB parts, ≈56 MiB on v7x)."""
    try:
        cap = int(pltpu.get_tpu_info().vmem_capacity_bytes)
    except Exception:
        cap = 128 * 1024 * 1024
    return min(int(cap * 0.9), cap - (8 << 20))


def _plan_tiling(B, L, D, Dh, budget_bytes):
    """Pick (block_b, mlp_chunks): largest batch block whose weights + activations fit VMEM."""
    vmax = max(3 * D, Dh, D)
    # per-layer streamed weights (bf16) + packed vectors, double-buffered across layers
    per_layer_w = (4 * D * D + 2 * D * Dh) * 2 + 8 * vmax * 4
    fixed = 2 * per_layer_w + D * vmax * 2        # + ln_final / text_projection slack
    # chunk the MLP hidden axis so the f32 h1 temporary is not the VMEM cap
    mlp_chunk = Dh
    while mlp_chunk > 512 and mlp_chunk % 2 == 0:
        mlp_chunk //= 2
    # f32 bytes live per sequence inside one batch block
    per_seq = 4 * L * (2 * D          # x input block (double-buffered)
                       + D            # residual-stream scratch
                       + 3 * D        # qkv
                       + 2 * D        # head outputs + attention temporaries
                       + mlp_chunk    # h1 chunk
                       + L)           # one head's score matrix
    avail = max(budget_bytes - fixed, per_seq)
    block_b = int(max(1, min(B, avail // per_seq)))
    return block_b, Dh // mlp_chunk


# --------------------------- parameter packing ------------------------------

def pack_layer_params(layers):
    """Stack per-layer params on a leading layer axis; pack the 8 small vectors."""
    D = layers[0]["wo"].shape[0]
    Dh = layers[0]["w1"].shape[-1]
    vmax = max(3 * D, Dh, D)

    def pack_vecs(lp):
        rows = [lp["ln1_w"], lp["ln1_b"], lp["ln2_w"], lp["ln2_b"],
                lp["bo"], lp["b2"], lp["bqkv"], lp["b1"]]
        v = jnp.zeros((8, vmax), jnp.float32)
        for i, r in enumerate(rows):
            r = jnp.asarray(r, jnp.float32).reshape(-1)
            v = v.at[i, :r.shape[0]].set(r)
        return v

    return dict(
        wqkv=jnp.stack([lp["wqkv"].astype(jnp.bfloat16) for lp in layers]),
        wo=jnp.stack([lp["wo"].astype(jnp.bfloat16) for lp in layers]),
        w1=jnp.stack([lp["w1"].astype(jnp.bfloat16) for lp in layers]),
        w2=jnp.stack([lp["w2"].astype(jnp.bfloat16) for lp in layers]),
        vecs=jnp.stack([pack_vecs(lp) for lp in layers]))


# ------------------------------ full forward -------------------------------

def text_encoder_forward(prompt, params, ctx):
    """Non-parallel branch of TextEncoder.forward."""
    n_cls = ctx["n_cls"]
    s = ctx["ctx_start_idx"]
    npl = ctx["n_prompt_tokens_L"]

    emb = params["init_pattern_embedding"][:n_cls]       # (n_cls, L, D)

    # incorporate_prompt (glue: pure slicing / concat)
    if prompt is not None:
        prefix = emb[:, :s, :]
        suffix = emb[:, s + npl:, :]
        if prompt.ndim == 2:
            prompt = jnp.broadcast_to(prompt[None], (n_cls,) + prompt.shape)
        x = jnp.concatenate([prefix, prompt, suffix], axis=1)
    else:
        x = emb

    B, L, D = x.shape
    Dh = params["stacked"]["w1"].shape[-1]

    # EOT one-hot (tiny plain-JAX glue); the actual gather + ln_final + projection
    # run fused inside the stack's last-layer epilogue.
    eot_idx = jnp.argmax(ctx["tokenized_pattern_prompts"][:n_cls], axis=-1)
    onehot = jax.nn.one_hot(eot_idx, L, dtype=jnp.float32).reshape(B, L, 1)

    budget = _vmem_budget_bytes()
    block_b, mlp_chunks = _plan_tiling(B, L, D, Dh, int(budget * 0.85))
    # Balance batch blocks and pad B so we never fall back to block_b == 1.
    # TODO(synk): on v7x, optionally force an even number of batch blocks so both
    # TensorCores get work when a single block would already cover the batch.
    n_blocks = -(-B // block_b)
    block_b = -(-B // n_blocks)
    B_pad = n_blocks * block_b
    if B_pad != B:
        x = jnp.pad(x, ((0, B_pad - B), (0, 0), (0, 0)))
        onehot = jnp.pad(onehot, ((0, B_pad - B), (0, 0), (0, 0)))

    out = encoder_stack(x, params["positional_embedding"], onehot, params["stacked"],
                        params["lnf_w"], params["lnf_b"], params["text_projection"],
                        n_heads=ctx["n_heads"], block_b=block_b,
                        mlp_chunks=mlp_chunks, vmem_limit_bytes=budget)
    return out[:n_cls]                                   # (n_cls, E)


# ----------------------------------- main -----------------------------------

if __name__ == "__main__":
    # Small, CLIP-consistent shapes
    n_cls = 2            # number of class prompts (batch)
    L = 8                # context length (seq)
    D = 32               # transformer width
    H = 4                # attention heads
    n_layers = 2
    E = 32               # text embedding dim (text_projection output)
    Dh = 4 * D           # MLP hidden
    ctx_start_idx = 1
    n_prompt_tokens_L = 4

    key = jax.random.PRNGKey(0)
    ks = iter(jax.random.split(key, 64))

    def nrm(shape, scale=0.02):
        return (scale * jax.random.normal(next(ks), shape)).astype(jnp.float32)

    layers = []
    for _ in range(n_layers):
        layers.append(dict(
            ln1_w=jnp.ones((D,), jnp.float32), ln1_b=jnp.zeros((D,), jnp.float32),
            wqkv=nrm((D, 3 * D)), bqkv=jnp.zeros((3 * D,), jnp.float32),
            wo=nrm((D, D)), bo=jnp.zeros((D,), jnp.float32),
            ln2_w=jnp.ones((D,), jnp.float32), ln2_b=jnp.zeros((D,), jnp.float32),
            w1=nrm((D, Dh)), b1=jnp.zeros((Dh,), jnp.float32),
            w2=nrm((Dh, D)), b2=jnp.zeros((D,), jnp.float32),
        ))
    stacked = pack_layer_params(layers)

    params = dict(
        stacked=stacked,
        positional_embedding=nrm((L, D), 0.01),
        lnf_w=jnp.ones((D,), jnp.float32),
        lnf_b=jnp.zeros((D,), jnp.float32),
        text_projection=nrm((D, E), D ** -0.5).astype(jnp.bfloat16),
        init_pattern_embedding=nrm((n_cls, L, D)),
    )

    # tokenized prompts: argmax along seq gives the EOT position per class
    tokenized = jnp.array(
        [[49406, 1, 2, 3, 4, 5, 49407, 0],
         [49406, 1, 2, 3, 4, 5, 6, 49407]], dtype=jnp.int32)

    ctx = dict(
        n_cls=n_cls,
        n_prompt_tokens_L=n_prompt_tokens_L,
        ctx_start_idx=ctx_start_idx,
        tokenized_pattern_prompts=tokenized,
        n_heads=H,
    )

    # learned prompt tokens (2-D -> broadcast to every class, like the module)
    prompt = nrm((n_prompt_tokens_L, D))

    # TODO(synk): parallel=True branch (pop_size population of prompts) is the same
    # fused stack over a (pop_size*n_cls) batch; only the non-parallel branch runs here.

    out = text_encoder_forward(prompt, params, ctx)
    out = jax.block_until_ready(out)
    assert out.shape == (n_cls, E)
    assert bool(jnp.all(jnp.isfinite(out)))
    print("KERNEL_OK")
</pallas_src>

<mosaic_0001>
module attributes {stable_mosaic.version = 11 : i64} {
  func.func @_encoder_stack_kernel(%arg0: i32, %arg1: i32, %arg2: memref<2x8x32xf32, #tpu.memory_space<vmem>>, %arg3: memref<1x8x32xf32, #tpu.memory_space<vmem>>, %arg4: memref<2x8x1xf32, #tpu.memory_space<vmem>>, %arg5: memref<1x8x128xf32, #tpu.memory_space<vmem>>, %arg6: memref<1x32x96xbf16, #tpu.memory_space<vmem>>, %arg7: memref<1x32x32xbf16, #tpu.memory_space<vmem>>, %arg8: memref<1x32x128xbf16, #tpu.memory_space<vmem>>, %arg9: memref<1x128x32xbf16, #tpu.memory_space<vmem>>, %arg10: memref<1x32xf32, #tpu.memory_space<vmem>>, %arg11: memref<1x32xf32, #tpu.memory_space<vmem>>, %arg12: memref<32x32xbf16, #tpu.memory_space<vmem>>, %arg13: memref<2x1x32xf32, #tpu.memory_space<vmem>>, %arg14: memref<2x8x32xf32, #tpu.memory_space<vmem>>) attributes {dimension_semantics = [#tpu.dimension_semantics<parallel>, #tpu.dimension_semantics<arbitrary>], iteration_bounds = array<i64: 1, 2>, scalar_prefetch = 0 : i64, scratch_operands = 1 : i64, tpu.core_type = #tpu.core_type<tc>, window_params = [{transform_indices = @transform_0, window_bounds = array<i64: 2, 8, 32>}, {pipeline_mode = #tpu.pipeline_mode<synchronous>, transform_indices = @transform_1, window_bounds = array<i64: 1, 8, 32>}, {transform_indices = @transform_2, window_bounds = array<i64: 2, 8, 1>}, {transform_indices = @transform_3, window_bounds = array<i64: 1, 8, 128>}, {transform_indices = @transform_4, window_bounds = array<i64: 1, 32, 96>}, {transform_indices = @transform_5, window_bounds = array<i64: 1, 32, 32>}, {transform_indices = @transform_6, window_bounds = array<i64: 1, 32, 128>}, {transform_indices = @transform_7, window_bounds = array<i64: 1, 128, 32>}, {pipeline_mode = #tpu.pipeline_mode<synchronous>, transform_indices = @transform_8, window_bounds = array<i64: 1, 32>}, {pipeline_mode = #tpu.pipeline_mode<synchronous>, transform_indices = @transform_9, window_bounds = array<i64: 1, 32>}, {pipeline_mode = #tpu.pipeline_mode<synchronous>, transform_indices = @transform_10, window_bounds = array<i64: 32, 32>}, {transform_indices = @transform_11, window_bounds = array<i64: 2, 1, 32>}]} {
    %c0_i32 = arith.constant 0 : i32
    %0 = arith.cmpi eq, %arg1, %c0_i32 : i32
    %1 = arith.extui %0 : i1 to i32
    %c0_i32_0 = arith.constant 0 : i32
    %2 = arith.cmpi ne, %1, %c0_i32_0 : i32
    scf.if %2 {
      %c0_61 = arith.constant 0 : index
      %c0_62 = arith.constant 0 : index
      %c0_63 = arith.constant 0 : index
      %216 = vector.load %arg2[%c0_61, %c0_62, %c0_63] : memref<2x8x32xf32, #tpu.memory_space<vmem>>, vector<2x8x32xf32>
      %c0_64 = arith.constant 0 : index
      %c0_65 = arith.constant 0 : index
      %c0_66 = arith.constant 0 : index
      %217 = vector.load %arg3[%c0_64, %c0_65, %c0_66] : memref<1x8x32xf32, #tpu.memory_space<vmem>>, vector<1x8x32xf32>
      %218 = vector.broadcast %217 : vector<1x8x32xf32> to vector<2x8x32xf32>
      %219 = arith.addf %216, %218 : vector<2x8x32xf32>
      %c0_67 = arith.constant 0 : index
      %c0_68 = arith.constant 0 : index
      %c0_69 = arith.constant 0 : index
      %220 = vector.load %arg14[%c0_67, %c0_68, %c0_69] : memref<2x8x32xf32, #tpu.memory_space<vmem>>, vector<2x8x32xf32>
      tpu.vector_store %arg14[%c0_67, %c0_68, %c0_69], %219 {strides = array<i32>} : memref<2x8x32xf32, #tpu.memory_space<vmem>>, vector<2x8x32xf32>,
    } else {
    }
    %c0 = arith.constant 0 : index
    %c0_1 = arith.constant 0 : index
    %c0_2 = arith.constant 0 : index
    %3 = vector.load %arg14[%c0, %c0_1, %c0_2] : memref<2x8x32xf32, #tpu.memory_space<vmem>>, vector<2x8x32xf32>
    %c0_3 = arith.constant 0 : index
    %c0_4 = arith.constant 0 : index
    %c0_5 = arith.constant 0 : index
    %4 = vector.load %arg5[%c0_3, %c0_4, %c0_5] : memref<1x8x128xf32, #tpu.memory_space<vmem>>, vector<1x8x128xf32>
    %5 = vector.shape_cast %4 : vector<1x8x128xf32> to vector<8x128xf32>
    %6 = vector.extract_strided_slice %5 {offsets = [0, 0], sizes = [1, 32], strides = [1, 1]} : vector<8x128xf32> to vector<1x32xf32>
    %7 = vector.extract_strided_slice %5 {offsets = [1, 0], sizes = [1, 32], strides = [1, 1]} : vector<8x128xf32> to vector<1x32xf32>
    %8 = vector.extract_strided_slice %5 {offsets = [2, 0], sizes = [1, 32], strides = [1, 1]} : vector<8x128xf32> to vector<1x32xf32>
    %9 = vector.extract_strided_slice %5 {offsets = [3, 0], sizes = [1, 32], strides = [1, 1]} : vector<8x128xf32> to vector<1x32xf32>
    %10 = vector.extract_strided_slice %5 {offsets = [4, 0], sizes = [1, 32], strides = [1, 1]} : vector<8x128xf32> to vector<1x32xf32>
    %11 = vector.extract_strided_slice %5 {offsets = [5, 0], sizes = [1, 32], strides = [1, 1]} : vector<8x128xf32> to vector<1x32xf32>
    %12 = vector.extract_strided_slice %5 {offsets = [6, 0], sizes = [1, 96], strides = [1, 1]} : vector<8x128xf32> to vector<1x96xf32>
    %13 = vector.extract_strided_slice %5 {offsets = [7, 0], sizes = [1, 128], strides = [1, 1]} : vector<8x128xf32> to vector<1x128xf32>
    %cst = arith.constant dense<0.000000e+00> : vector<2x8xf32>
    %14 = vector.multi_reduction <add>, %3, %cst [2] : vector<2x8x32xf32> to vector<2x8xf32>
    %15 = vector.shape_cast %14 : vector<2x8xf32> to vector<2x8x1xf32>
    %cst_6 = arith.constant 3.200000e+01 : f32
    %16 = vector.broadcast %cst_6 : f32 to vector<2x8x1xf32>
    %17 = arith.divf %15, %16 : vector<2x8x1xf32>
    %18 = vector.broadcast %17 : vector<2x8x1xf32> to vector<2x8x32xf32>
    %19 = arith.subf %3, %18 : vector<2x8x32xf32>
    %20 = arith.mulf %19, %19 : vector<2x8x32xf32>
    %cst_7 = arith.constant dense<0.000000e+00> : vector<2x8xf32>
    %21 = vector.multi_reduction <add>, %20, %cst_7 [2] : vector<2x8x32xf32> to vector<2x8xf32>
    %22 = vector.shape_cast %21 : vector<2x8xf32> to vector<2x8x1xf32>
    %cst_8 = arith.constant 3.200000e+01 : f32
    %23 = vector.broadcast %cst_8 : f32 to vector<2x8x1xf32>
    %24 = arith.divf %22, %23 : vector<2x8x1xf32>
    %25 = vector.broadcast %17 : vector<2x8x1xf32> to vector<2x8x32xf32>
    %26 = arith.subf %3, %25 : vector<2x8x32xf32>
    %cst_9 = arith.constant 9.99999974E-6 : f32
    %27 = vector.broadcast %cst_9 : f32 to vector<2x8x1xf32>
    %28 = arith.addf %24, %27 : vector<2x8x1xf32>
    %29 = math.rsqrt %28 : vector<2x8x1xf32>
    %30 = vector.broadcast %29 : vector<2x8x1xf32> to vector<2x8x32xf32>
    %31 = arith.mulf %26, %30 : vector<2x8x32xf32>
    %32 = vector.shape_cast %6 : vector<1x32xf32> to vector<1x1x32xf32>
    %33 = vector.broadcast %32 : vector<1x1x32xf32> to vector<2x8x32xf32>
    %34 = arith.mulf %31, %33 : vector<2x8x32xf32>
    %35 = vector.shape_cast %7 : vector<1x32xf32> to vector<1x1x32xf32>
    %36 = vector.broadcast %35 : vector<1x1x32xf32> to vector<2x8x32xf32>
    %37 = arith.addf %34, %36 : vector<2x8x32xf32>
    %38 = vector.shape_cast %37 : vector<2x8x32xf32> to vector<16x32xf32>
    %39 = arith.truncf %38 : vector<16x32xf32> to vector<16x32xbf16>
    %c0_10 = arith.constant 0 : index
    %c0_11 = arith.constant 0 : index
    %c0_12 = arith.constant 0 : index
    %40 = vector.load %arg6[%c0_10, %c0_11, %c0_12] : memref<1x32x96xbf16, #tpu.memory_space<vmem>>, vector<1x32x96xbf16>
    %41 = vector.shape_cast %40 : vector<1x32x96xbf16> to vector<32x96xbf16>
    %cst_13 = arith.constant dense<0.000000e+00> : vector<16x96xf32>
    %42 = tpu.matmul %39, %41, %cst_13 {dimension_numbers = #tpu.dot_dimension_numbers<[1], [0], [0], [1], [0, 0, 1, 1], [], []>} : vector<16x32xbf16>, vector<32x96xbf16>, vector<16x96xf32> -> vector<16x96xf32>
    %43 = vector.broadcast %12 : vector<1x96xf32> to vector<16x96xf32>
    %44 = arith.addf %42, %43 : vector<16x96xf32>
    %45 = vector.extract_strided_slice %44 {offsets = [0, 0], sizes = [16, 32], strides = [1, 1]} : vector<16x96xf32> to vector<16x32xf32>
    %46 = vector.shape_cast %45 : vector<16x32xf32> to vector<2x8x32xf32>
    %47 = vector.extract_strided_slice %44 {offsets = [0, 32], sizes = [16, 32], strides = [1, 1]} : vector<16x96xf32> to vector<16x32xf32>
    %48 = vector.shape_cast %47 : vector<16x32xf32> to vector<2x8x32xf32>
    %49 = vector.extract_strided_slice %44 {offsets = [0, 64], sizes = [16, 32], strides = [1, 1]} : vector<16x96xf32> to vector<16x32xf32>
    %50 = vector.shape_cast %49 : vector<16x32xf32> to vector<2x8x32xf32>
    %51 = tpu.iota {dimensions = array<i32: 0>} : vector<8x8xi32>
    %52 = tpu.iota {dimensions = array<i32: 1>} : vector<8x8xi32>
    %53 = arith.cmpi sle, %52, %51 : vector<8x8xi32>
    %54 = vector.shape_cast %53 : vector<8x8xi1> to vector<1x8x8xi1>
    %55 = vector.extract_strided_slice %46 {offsets = [0, 0, 0], sizes = [2, 8, 8], strides = [1, 1, 1]} : vector<2x8x32xf32> to vector<2x8x8xf32>
    %56 = arith.truncf %55 : vector<2x8x8xf32> to vector<2x8x8xbf16>
    %57 = vector.extract_strided_slice %48 {offsets = [0, 0, 0], sizes = [2, 8, 8], strides = [1, 1, 1]} : vector<2x8x32xf32> to vector<2x8x8xf32>
    %58 = arith.truncf %57 : vector<2x8x8xf32> to vector<2x8x8xbf16>
    %59 = vector.extract_strided_slice %50 {offsets = [0, 0, 0], sizes = [2, 8, 8], strides = [1, 1, 1]} : vector<2x8x32xf32> to vector<2x8x8xf32>
    %60 = arith.truncf %59 : vector<2x8x8xf32> to vector<2x8x8xbf16>
    "tpu.trace_start"() <{level = 10 : i32, message = "bld,bmd->blm"}> : () -> ()
    %cst_14 = arith.constant dense<0.000000e+00> : vector<2x8x8xf32>
    %61 = tpu.matmul %56, %58, %cst_14 {dimension_numbers = #tpu.dot_dimension_numbers<[2], [2], [1], [1], [0, 0, 0, 1, 1, 1], [0], [0]>} : vector<2x8x8xbf16>, vector<2x8x8xbf16>, vector<2x8x8xf32> -> vector<2x8x8xf32>
    "tpu.trace_stop"() : () -> ()
    %cst_15 = arith.constant 0.353553385 : f32
    %62 = vector.broadcast %cst_15 : f32 to vector<2x8x8xf32>
    %63 = arith.mulf %61, %62 : vector<2x8x8xf32>
    %cst_16 = arith.constant -1.000000e+30 : f32
    %64 = vector.shape_cast %54 : vector<1x8x8xi1> to vector<1x8x8xi1>
    %65 = vector.broadcast %64 : vector<1x8x8xi1> to vector<2x8x8xi1>
    %66 = vector.broadcast %cst_16 : f32 to vector<2x8x8xf32>
    %67 = arith.select %65, %63, %66 : vector<2x8x8xi1>, vector<2x8x8xf32>
    %cst_17 = arith.constant dense<0xFF800000> : vector<2x8xf32>
    %68 = vector.multi_reduction <maximumf>, %67, %cst_17 [2] : vector<2x8x8xf32> to vector<2x8xf32>
    %69 = vector.shape_cast %68 : vector<2x8xf32> to vector<2x8x1xf32>
    %70 = vector.broadcast %69 : vector<2x8x1xf32> to vector<2x8x8xf32>
    %71 = arith.subf %67, %70 : vector<2x8x8xf32>
    %72 = math.exp %71 : vector<2x8x8xf32>
    %cst_18 = arith.constant dense<0.000000e+00> : vector<2x8xf32>
    %73 = vector.multi_reduction <add>, %72, %cst_18 [2] : vector<2x8x8xf32> to vector<2x8xf32>
    %74 = vector.shape_cast %73 : vector<2x8xf32> to vector<2x8x1xf32>
    %75 = tpu.reciprocal %74 {approx = true} : vector<2x8x1xf32> -> vector<2x8x1xf32>
    %76 = vector.broadcast %75 : vector<2x8x1xf32> to vector<2x8x8xf32>
    %77 = arith.mulf %72, %76 : vector<2x8x8xf32>
    %78 = arith.truncf %77 : vector<2x8x8xf32> to vector<2x8x8xbf16>
    "tpu.trace_start"() <{level = 10 : i32, message = "blm,bmd->bld"}> : () -> ()
    %cst_19 = arith.constant dense<0.000000e+00> : vector<2x8x8xf32>
    %79 = tpu.matmul %78, %60, %cst_19 {dimension_numbers = #tpu.dot_dimension_numbers<[2], [1], [1], [2], [0, 0, 0, 1, 1, 2], [0], [0]>} : vector<2x8x8xbf16>, vector<2x8x8xbf16>, vector<2x8x8xf32> -> vector<2x8x8xf32>
    "tpu.trace_stop"() : () -> ()
    %80 = vector.extract_strided_slice %46 {offsets = [0, 0, 8], sizes = [2, 8, 8], strides = [1, 1, 1]} : vector<2x8x32xf32> to vector<2x8x8xf32>
    %81 = arith.truncf %80 : vector<2x8x8xf32> to vector<2x8x8xbf16>
    %82 = vector.extract_strided_slice %48 {offsets = [0, 0, 8], sizes = [2, 8, 8], strides = [1, 1, 1]} : vector<2x8x32xf32> to vector<2x8x8xf32>
    %83 = arith.truncf %82 : vector<2x8x8xf32> to vector<2x8x8xbf16>
    %84 = vector.extract_strided_slice %50 {offsets = [0, 0, 8], sizes = [2, 8, 8], strides = [1, 1, 1]} : vector<2x8x32xf32> to vector<2x8x8xf32>
    %85 = arith.truncf %84 : vector<2x8x8xf32> to vector<2x8x8xbf16>
    "tpu.trace_start"() <{level = 10 : i32, message = "bld,bmd->blm"}> : () -> ()
    %cst_20 = arith.constant dense<0.000000e+00> : vector<2x8x8xf32>
    %86 = tpu.matmul %81, %83, %cst_20 {dimension_numbers = #tpu.dot_dimension_numbers<[2], [2], [1], [1], [0, 0, 0, 1, 1, 1], [0], [0]>} : vector<2x8x8xbf16>, vector<2x8x8xbf16>, vector<2x8x8xf32> -> vector<2x8x8xf32>
    "tpu.trace_stop"() : () -> ()
    %cst_21 = arith.constant 0.353553385 : f32
    %87 = vector.broadcast %cst_21 : f32 to vector<2x8x8xf32>
    %88 = arith.mulf %86, %87 : vector<2x8x8xf32>
    %cst_22 = arith.constant -1.000000e+30 : f32
    %89 = vector.shape_cast %54 : vector<1x8x8xi1> to vector<1x8x8xi1>
    %90 = vector.broadcast %89 : vector<1x8x8xi1> to vector<2x8x8xi1>
    %91 = vector.broadcast %cst_22 : f32 to vector<2x8x8xf32>
    %92 = arith.select %90, %88, %91 : vector<2x8x8xi1>, vector<2x8x8xf32>
    %cst_23 = arith.constant dense<0xFF800000> : vector<2x8xf32>
    %93 = vector.multi_reduction <maximumf>, %92, %cst_23 [2] : vector<2x8x8xf32> to vector<2x8xf32>
    %94 = vector.shape_cast %93 : vector<2x8xf32> to vector<2x8x1xf32>
    %95 = vector.broadcast %94 : vector<2x8x1xf32> to vector<2x8x8xf32>
    %96 = arith.subf %92, %95 : vector<2x8x8xf32>
    %97 = math.exp %96 : vector<2x8x8xf32>
    %cst_24 = arith.constant dense<0.000000e+00> : vector<2x8xf32>
    %98 = vector.multi_reduction <add>, %97, %cst_24 [2] : vector<2x8x8xf32> to vector<2x8xf32>
    %99 = vector.shape_cast %98 : vector<2x8xf32> to vector<2x8x1xf32>
    %100 = tpu.reciprocal %99 {approx = true} : vector<2x8x1xf32> -> vector<2x8x1xf32>
    %101 = vector.broadcast %100 : vector<2x8x1xf32> to vector<2x8x8xf32>
    %102 = arith.mulf %97, %101 : vector<2x8x8xf32>
    %103 = arith.truncf %102 : vector<2x8x8xf32> to vector<2x8x8xbf16>
    "tpu.trace_start"() <{level = 10 : i32, message = "blm,bmd->bld"}> : () -> ()
    %cst_25 = arith.constant dense<0.000000e+00> : vector<2x8x8xf32>
    %104 = tpu.matmul %103, %85, %cst_25 {dimension_numbers = #tpu.dot_dimension_numbers<[2], [1], [1], [2], [0, 0, 0, 1, 1, 2], [0], [0]>} : vector<2x8x8xbf16>, vector<2x8x8xbf16>, vector<2x8x8xf32> -> vector<2x8x8xf32>
    "tpu.trace_stop"() : () -> ()
    %105 = vector.extract_strided_slice %46 {offsets = [0, 0, 16], sizes = [2, 8, 8], strides = [1, 1, 1]} : vector<2x8x32xf32> to vector<2x8x8xf32>
    %106 = arith.truncf %105 : vector<2x8x8xf32> to vector<2x8x8xbf16>
    %107 = vector.extract_strided_slice %48 {offsets = [0, 0, 16], sizes = [2, 8, 8], strides = [1, 1, 1]} : vector<2x8x32xf32> to vector<2x8x8xf32>
    %108 = arith.truncf %107 : vector<2x8x8xf32> to vector<2x8x8xbf16>
    %109 = vector.extract_strided_slice %50 {offsets = [0, 0, 16], sizes = [2, 8, 8], strides = [1, 1, 1]} : vector<2x8x32xf32> to vector<2x8x8xf32>
    %110 = arith.truncf %109 : vector<2x8x8xf32> to vector<2x8x8xbf16>
    "tpu.trace_start"() <{level = 10 : i32, message = "bld,bmd->blm"}> : () -> ()
    %cst_26 = arith.constant dense<0.000000e+00> : vector<2x8x8xf32>
    %111 = tpu.matmul %106, %108, %cst_26 {dimension_numbers = #tpu.dot_dimension_numbers<[2], [2], [1], [1], [0, 0, 0, 1, 1, 1], [0], [0]>} : vector<2x8x8xbf16>, vector<2x8x8xbf16>, vector<2x8x8xf32> -> vector<2x8x8xf32>
    "tpu.trace_stop"() : () -> ()
    %cst_27 = arith.constant 0.353553385 : f32
    %112 = vector.broadcast %cst_27 : f32 to vector<2x8x8xf32>
    %113 = arith.mulf %111, %112 : vector<2x8x8xf32>
    %cst_28 = arith.constant -1.000000e+30 : f32
    %114 = vector.shape_cast %54 : vector<1x8x8xi1> to vector<1x8x8xi1>
    %115 = vector.broadcast %114 : vector<1x8x8xi1> to vector<2x8x8xi1>
    %116 = vector.broadcast %cst_28 : f32 to vector<2x8x8xf32>
    %117 = arith.select %115, %113, %116 : vector<2x8x8xi1>, vector<2x8x8xf32>
    %cst_29 = arith.constant dense<0xFF800000> : vector<2x8xf32>
    %118 = vector.multi_reduction <maximumf>, %117, %cst_29 [2] : vector<2x8x8xf32> to vector<2x8xf32>
    %119 = vector.shape_cast %118 : vector<2x8xf32> to vector<2x8x1xf32>
    %120 = vector.broadcast %119 : vector<2x8x1xf32> to vector<2x8x8xf32>
    %121 = arith.subf %117, %120 : vector<2x8x8xf32>
    %122 = math.exp %121 : vector<2x8x8xf32>
    %cst_30 = arith.constant dense<0.000000e+00> : vector<2x8xf32>
    %123 = vector.multi_reduction <add>, %122, %cst_30 [2] : vector<2x8x8xf32> to vector<2x8xf32>
    %124 = vector.shape_cast %123 : vector<2x8xf32> to vector<2x8x1xf32>
    %125 = tpu.reciprocal %124 {approx = true} : vector<2x8x1xf32> -> vector<2x8x1xf32>
    %126 = vector.broadcast %125 : vector<2x8x1xf32> to vector<2x8x8xf32>
    %127 = arith.mulf %122, %126 : vector<2x8x8xf32>
    %128 = arith.truncf %127 : vector<2x8x8xf32> to vector<2x8x8xbf16>
    "tpu.trace_start"() <{level = 10 : i32, message = "blm,bmd->bld"}> : () -> ()
    %cst_31 = arith.constant dense<0.000000e+00> : vector<2x8x8xf32>
    %129 = tpu.matmul %128, %110, %cst_31 {dimension_numbers = #tpu.dot_dimension_numbers<[2], [1], [1], [2], [0, 0, 0, 1, 1, 2], [0], [0]>} : vector<2x8x8xbf16>, vector<2x8x8xbf16>, vector<2x8x8xf32> -> vector<2x8x8xf32>
    "tpu.trace_stop"() : () -> ()
    %130 = vector.extract_strided_slice %46 {offsets = [0, 0, 24], sizes = [2, 8, 8], strides = [1, 1, 1]} : vector<2x8x32xf32> to vector<2x8x8xf32>
    %131 = arith.truncf %130 : vector<2x8x8xf32> to vector<2x8x8xbf16>
    %132 = vector.extract_strided_slice %48 {offsets = [0, 0, 24], sizes = [2, 8, 8], strides = [1, 1, 1]} : vector<2x8x32xf32> to vector<2x8x8xf32>
    %133 = arith.truncf %132 : vector<2x8x8xf32> to vector<2x8x8xbf16>
    %134 = vector.extract_strided_slice %50 {offsets = [0, 0, 24], sizes = [2, 8, 8], strides = [1, 1, 1]} : vector<2x8x32xf32> to vector<2x8x8xf32>
    %135 = arith.truncf %134 : vector<2x8x8xf32> to vector<2x8x8xbf16>
    "tpu.trace_start"() <{level = 10 : i32, message = "bld,bmd->blm"}> : () -> ()
    %cst_32 = arith.constant dense<0.000000e+00> : vector<2x8x8xf32>
    %136 = tpu.matmul %131, %133, %cst_32 {dimension_numbers = #tpu.dot_dimension_numbers<[2], [2], [1], [1], [0, 0, 0, 1, 1, 1], [0], [0]>} : vector<2x8x8xbf16>, vector<2x8x8xbf16>, vector<2x8x8xf32> -> vector<2x8x8xf32>
    "tpu.trace_stop"() : () -> ()
    %cst_33 = arith.constant 0.353553385 : f32
    %137 = vector.broadcast %cst_33 : f32 to vector<2x8x8xf32>
    %138 = arith.mulf %136, %137 : vector<2x8x8xf32>
    %cst_34 = arith.constant -1.000000e+30 : f32
    %139 = vector.shape_cast %54 : vector<1x8x8xi1> to vector<1x8x8xi1>
    %140 = vector.broadcast %139 : vector<1x8x8xi1> to vector<2x8x8xi1>
    %141 = vector.broadcast %cst_34 : f32 to vector<2x8x8xf32>
    %142 = arith.select %140, %138, %141 : vector<2x8x8xi1>, vector<2x8x8xf32>
    %cst_35 = arith.constant dense<0xFF800000> : vector<2x8xf32>
    %143 = vector.multi_reduction <maximumf>, %142, %cst_35 [2] : vector<2x8x8xf32> to vector<2x8xf32>
    %144 = vector.shape_cast %143 : vector<2x8xf32> to vector<2x8x1xf32>
    %145 = vector.broadcast %144 : vector<2x8x1xf32> to vector<2x8x8xf32>
    %146 = arith.subf %142, %145 : vector<2x8x8xf32>
    %147 = math.exp %146 : vector<2x8x8xf32>
    %cst_36 = arith.constant dense<0.000000e+00> : vector<2x8xf32>
    %148 = vector.multi_reduction <add>, %147, %cst_36 [2] : vector<2x8x8xf32> to vector<2x8xf32>
    %149 = vector.shape_cast %148 : vector<2x8xf32> to vector<2x8x1xf32>
    %150 = tpu.reciprocal %149 {approx = true} : vector<2x8x1xf32> -> vector<2x8x1xf32>
    %151 = vector.broadcast %150 : vector<2x8x1xf32> to vector<2x8x8xf32>
    %152 = arith.mulf %147, %151 : vector<2x8x8xf32>
    %153 = arith.truncf %152 : vector<2x8x8xf32> to vector<2x8x8xbf16>
    "tpu.trace_start"() <{level = 10 : i32, message = "blm,bmd->bld"}> : () -> ()
    %cst_37 = arith.constant dense<0.000000e+00> : vector<2x8x8xf32>
    %154 = tpu.matmul %153, %135, %cst_37 {dimension_numbers = #tpu.dot_dimension_numbers<[2], [1], [1], [2], [0, 0, 0, 1, 1, 2], [0], [0]>} : vector<2x8x8xbf16>, vector<2x8x8xbf16>, vector<2x8x8xf32> -> vector<2x8x8xf32>
    "tpu.trace_stop"() : () -> ()
    %155 = tpu.concatenate %79, %104, %129, %154 in 2 : vector<2x8x8xf32>, vector<2x8x8xf32>, vector<2x8x8xf32>, vector<2x8x8xf32> -> vector<2x8x32xf32>
    %156 = vector.shape_cast %155 : vector<2x8x32xf32> to vector<16x32xf32>
    %157 = arith.truncf %156 : vector<16x32xf32> to vector<16x32xbf16>
    %c0_38 = arith.constant 0 : index
    %c0_39 = arith.constant 0 : index
    %c0_40 = arith.constant 0 : index
    %158 = vector.load %arg7[%c0_38, %c0_39, %c0_40] : memref<1x32x32xbf16, #tpu.memory_space<vmem>>, vector<1x32x32xbf16>
    %159 = vector.shape_cast %158 : vector<1x32x32xbf16> to vector<32x32xbf16>
    %cst_41 = arith.constant dense<0.000000e+00> : vector<16x32xf32>
    %160 = tpu.matmul %157, %159, %cst_41 {dimension_numbers = #tpu.dot_dimension_numbers<[1], [0], [0], [1], [0, 0, 1, 1], [], []>} : vector<16x32xbf16>, vector<32x32xbf16>, vector<16x32xf32> -> vector<16x32xf32>
    %161 = vector.broadcast %10 : vector<1x32xf32> to vector<16x32xf32>
    %162 = arith.addf %160, %161 : vector<16x32xf32>
    %163 = vector.shape_cast %162 : vector<16x32xf32> to vector<2x8x32xf32>
    %164 = arith.addf %3, %163 : vector<2x8x32xf32>
    %cst_42 = arith.constant dense<0.000000e+00> : vector<2x8xf32>
    %165 = vector.multi_reduction <add>, %164, %cst_42 [2] : vector<2x8x32xf32> to vector<2x8xf32>
    %166 = vector.shape_cast %165 : vector<2x8xf32> to vector<2x8x1xf32>
    %cst_43 = arith.constant 3.200000e+01 : f32
    %167 = vector.broadcast %cst_43 : f32 to vector<2x8x1xf32>
    %168 = arith.divf %166, %167 : vector<2x8x1xf32>
    %169 = vector.broadcast %168 : vector<2x8x1xf32> to vector<2x8x32xf32>
    %170 = arith.subf %164, %169 : vector<2x8x32xf32>
    %171 = arith.mulf %170, %170 : vector<2x8x32xf32>
    %cst_44 = arith.constant dense<0.000000e+00> : vector<2x8xf32>
    %172 = vector.multi_reduction <add>, %171, %cst_44 [2] : vector<2x8x32xf32> to vector<2x8xf32>
    %173 = vector.shape_cast %172 : vector<2x8xf32> to vector<2x8x1xf32>
    %cst_45 = arith.constant 3.200000e+01 : f32
    %174 = vector.broadcast %cst_45 : f32 to vector<2x8x1xf32>
    %175 = arith.divf %173, %174 : vector<2x8x1xf32>
    %176 = vector.broadcast %168 : vector<2x8x1xf32> to vector<2x8x32xf32>
    %177 = arith.subf %164, %176 : vector<2x8x32xf32>
    %cst_46 = arith.constant 9.99999974E-6 : f32
    %178 = vector.broadcast %cst_46 : f32 to vector<2x8x1xf32>
    %179 = arith.addf %175, %178 : vector<2x8x1xf32>
    %180 = math.rsqrt %179 : vector<2x8x1xf32>
    %181 = vector.broadcast %180 : vector<2x8x1xf32> to vector<2x8x32xf32>
    %182 = arith.mulf %177, %181 : vector<2x8x32xf32>
    %183 = vector.shape_cast %8 : vector<1x32xf32> to vector<1x1x32xf32>
    %184 = vector.broadcast %183 : vector<1x1x32xf32> to vector<2x8x32xf32>
    %185 = arith.mulf %182, %184 : vector<2x8x32xf32>
    %186 = vector.shape_cast %9 : vector<1x32xf32> to vector<1x1x32xf32>
    %187 = vector.broadcast %186 : vector<1x1x32xf32> to vector<2x8x32xf32>
    %188 = arith.addf %185, %187 : vector<2x8x32xf32>
    %189 = vector.shape_cast %188 : vector<2x8x32xf32> to vector<16x32xf32>
    %190 = arith.truncf %189 : vector<16x32xf32> to vector<16x32xbf16>
    %c0_47 = arith.constant 0 : index
    %c0_48 = arith.constant 0 : index
    %c0_49 = arith.constant 0 : index
    %191 = vector.load %arg8[%c0_47, %c0_48, %c0_49] : memref<1x32x128xbf16, #tpu.memory_space<vmem>>, vector<1x32x128xbf16>
    %192 = vector.shape_cast %191 : vector<1x32x128xbf16> to vector<32x128xbf16>
    %cst_50 = arith.constant dense<0.000000e+00> : vector<16x128xf32>
    %193 = tpu.matmul %190, %192, %cst_50 {dimension_numbers = #tpu.dot_dimension_numbers<[1], [0], [0], [1], [0, 0, 1, 1], [], []>} : vector<16x32xbf16>, vector<32x128xbf16>, vector<16x128xf32> -> vector<16x128xf32>
    %194 = vector.broadcast %13 : vector<1x128xf32> to vector<16x128xf32>
    %195 = arith.addf %193, %194 : vector<16x128xf32>
    %cst_51 = arith.constant 1.702000e+00 : f32
    %196 = vector.broadcast %cst_51 : f32 to vector<16x128xf32>
    %197 = arith.mulf %196, %195 : vector<16x128xf32>
    %198 = arith.negf %197 : vector<16x128xf32>
    %199 = math.exp %198 : vector<16x128xf32>
    %cst_52 = arith.constant 1.000000e+00 : f32
    %200 = vector.broadcast %cst_52 : f32 to vector<16x128xf32>
    %201 = arith.addf %200, %199 : vector<16x128xf32>
    %202 = arith.divf %200, %201 : vector<16x128xf32>
    %203 = arith.mulf %195, %202 : vector<16x128xf32>
    %204 = arith.truncf %203 : vector<16x128xf32> to vector<16x128xbf16>
    %c0_53 = arith.constant 0 : index
    %c0_54 = arith.constant 0 : index
    %c0_55 = arith.constant 0 : index
    %205 = vector.load %arg9[%c0_53, %c0_54, %c0_55] : memref<1x128x32xbf16, #tpu.memory_space<vmem>>, vector<1x128x32xbf16>
    %206 = vector.shape_cast %205 : vector<1x128x32xbf16> to vector<128x32xbf16>
    %cst_56 = arith.constant dense<0.000000e+00> : vector<16x32xf32>
    %207 = tpu.matmul %204, %206, %cst_56 {dimension_numbers = #tpu.dot_dimension_numbers<[1], [0], [0], [1], [0, 0, 1, 1], [], []>} : vector<16x128xbf16>, vector<128x32xbf16>, vector<16x32xf32> -> vector<16x32xf32>
    %208 = vector.broadcast %11 : vector<1x32xf32> to vector<16x32xf32>
    %209 = arith.addf %207, %208 : vector<16x32xf32>
    %210 = vector.shape_cast %209 : vector<16x32xf32> to vector<2x8x32xf32>
    %211 = arith.addf %164, %210 : vector<2x8x32xf32>
    %c0_57 = arith.constant 0 : index
    %c0_58 = arith.constant 0 : index
    %c0_59 = arith.constant 0 : index
    %212 = vector.load %arg14[%c0_57, %c0_58, %c0_59] : memref<2x8x32xf32, #tpu.memory_space<vmem>>, vector<2x8x32xf32>
    tpu.vector_store %arg14[%c0_57, %c0_58, %c0_59], %211 {strides = array<i32>} : memref<2x8x32xf32, #tpu.memory_space<vmem>>, vector<2x8x32xf32>,
    %c1_i32 = arith.constant 1 : i32
    %213 = arith.cmpi eq, %arg1, %c1_i32 : i32
    %214 = arith.extui %213 : i1 to i32
    %c0_i32_60 = arith.constant 0 : i32
    %215 = arith.cmpi ne, %214, %c0_i32_60 : i32
    scf.if %215 {
      %c0_61 = arith.constant 0 : index
      %c0_62 = arith.constant 0 : index
      %c0_63 = arith.constant 0 : index
      %216 = vector.load %arg4[%c0_61, %c0_62, %c0_63] : memref<2x8x1xf32, #tpu.memory_space<vmem>>, vector<2x8x1xf32>
      %217 = vector.broadcast %216 : vector<2x8x1xf32> to vector<2x8x32xf32>
      %218 = arith.mulf %211, %217 : vector<2x8x32xf32>
      %cst_64 = arith.constant dense<0.000000e+00> : vector<2x32xf32>
      %219 = vector.multi_reduction <add>, %218, %cst_64 [1] : vector<2x8x32xf32> to vector<2x32xf32>
      %c0_65 = arith.constant 0 : index
      %c0_66 = arith.constant 0 : index
      %220 = vector.load %arg10[%c0_65, %c0_66] : memref<1x32xf32, #tpu.memory_space<vmem>>, vector<1x32xf32>
      %c0_67 = arith.constant 0 : index
      %c0_68 = arith.constant 0 : index
      %221 = vector.load %arg11[%c0_67, %c0_68] : memref<1x32xf32, #tpu.memory_space<vmem>>, vector<1x32xf32>
      %cst_69 = arith.constant dense<0.000000e+00> : vector<2xf32>
      %222 = vector.multi_reduction <add>, %219, %cst_69 [1] : vector<2x32xf32> to vector<2xf32>
      %223 = vector.shape_cast %222 : vector<2xf32> to vector<2x1xf32>
      %cst_70 = arith.constant 3.200000e+01 : f32
      %224 = vector.broadcast %cst_70 : f32 to vector<2x1xf32>
      %225 = arith.divf %223, %224 : vector<2x1xf32>
      %226 = vector.broadcast %225 : vector<2x1xf32> to vector<2x32xf32>
      %227 = arith.subf %219, %226 : vector<2x32xf32>
      %228 = arith.mulf %227, %227 : vector<2x32xf32>
      %cst_71 = arith.constant dense<0.000000e+00> : vector<2xf32>
      %229 = vector.multi_reduction <add>, %228, %cst_71 [1] : vector<2x32xf32> to vector<2xf32>
      %230 = vector.shape_cast %229 : vector<2xf32> to vector<2x1xf32>
      %cst_72 = arith.constant 3.200000e+01 : f32
      %231 = vector.broadcast %cst_72 : f32 to vector<2x1xf32>
      %232 = arith.divf %230, %231 : vector<2x1xf32>
      %233 = vector.broadcast %225 : vector<2x1xf32> to vector<2x32xf32>
      %234 = arith.subf %219, %233 : vector<2x32xf32>
      %cst_73 = arith.constant 9.99999974E-6 : f32
      %235 = vector.broadcast %cst_73 : f32 to vector<2x1xf32>
      %236 = arith.addf %232, %235 : vector<2x1xf32>
      %237 = math.rsqrt %236 : vector<2x1xf32>
      %238 = vector.broadcast %237 : vector<2x1xf32> to vector<2x32xf32>
      %239 = arith.mulf %234, %238 : vector<2x32xf32>
      %240 = vector.broadcast %220 : vector<1x32xf32> to vector<2x32xf32>
      %241 = arith.mulf %239, %240 : vector<2x32xf32>
      %242 = vector.broadcast %221 : vector<1x32xf32> to vector<2x32xf32>
      %243 = arith.addf %241, %242 : vector<2x32xf32>
      %244 = arith.truncf %243 : vector<2x32xf32> to vector<2x32xbf16>
      %c0_74 = arith.constant 0 : index
      %c0_75 = arith.constant 0 : index
      %245 = vector.load %arg12[%c0_74, %c0_75] : memref<32x32xbf16, #tpu.memory_space<vmem>>, vector<32x32xbf16>
      %cst_76 = arith.constant dense<0.000000e+00> : vector<2x32xf32>
      %246 = tpu.matmul %244, %245, %cst_76 {dimension_numbers = #tpu.dot_dimension_numbers<[1], [0], [0], [1], [0, 0, 1, 1], [], []>} : vector<2x32xbf16>, vector<32x32xbf16>, vector<2x32xf32> -> vector<2x32xf32>
      %247 = vector.shape_cast %246 : vector<2x32xf32> to vector<2x1x32xf32>
      %c0_77 = arith.constant 0 : index
      %c0_78 = arith.constant 0 : index
      %c0_79 = arith.constant 0 : index
      %248 = vector.load %arg13[%c0_77, %c0_78, %c0_79] : memref<2x1x32xf32, #tpu.memory_space<vmem>>, vector<2x1x32xf32>
      tpu.vector_store %arg13[%c0_77, %c0_78, %c0_79], %247 {strides = array<i32>} : memref<2x1x32xf32, #tpu.memory_space<vmem>>, vector<2x1x32xf32>,
    } else {
    }
    return
  }
  func.func @transform_0(%arg0: i32, %arg1: i32) -> (i32, i32, i32) {
    %c0_i32 = arith.constant 0 : i32
    %c0_i32_0 = arith.constant 0 : i32
    %c0_i32_1 = arith.constant 0 : i32
    return %arg0, %c0_i32, %c0_i32_0 : i32, i32, i32
  }
  func.func @transform_1(%arg0: i32, %arg1: i32) -> (i32, i32, i32) {
    %c0_i32 = arith.constant 0 : i32
    %c0_i32_0 = arith.constant 0 : i32
    %c0_i32_1 = arith.constant 0 : i32
    %c0_i32_2 = arith.constant 0 : i32
    return %c0_i32, %c0_i32_0, %c0_i32_1 : i32, i32, i32
  }
  func.func @transform_2(%arg0: i32, %arg1: i32) -> (i32, i32, i32) {
    %c0_i32 = arith.constant 0 : i32
    %c0_i32_0 = arith.constant 0 : i32
    %c0_i32_1 = arith.constant 0 : i32
    return %arg0, %c0_i32, %c0_i32_0 : i32, i32, i32
  }
  func.func @transform_3(%arg0: i32, %arg1: i32) -> (i32, i32, i32) {
    %c0_i32 = arith.constant 0 : i32
    %c0_i32_0 = arith.constant 0 : i32
    %c0_i32_1 = arith.constant 0 : i32
    return %arg1, %c0_i32, %c0_i32_0 : i32, i32, i32
  }
  func.func @transform_4(%arg0: i32, %arg1: i32) -> (i32, i32, i32) {
    %c0_i32 = arith.constant 0 : i32
    %c0_i32_0 = arith.constant 0 : i32
    %c0_i32_1 = arith.constant 0 : i32
    return %arg1, %c0_i32, %c0_i32_0 : i32, i32, i32
  }
  func.func @transform_5(%arg0: i32, %arg1: i32) -> (i32, i32, i32) {
    %c0_i32 = arith.constant 0 : i32
    %c0_i32_0 = arith.constant 0 : i32
    %c0_i32_1 = arith.constant 0 : i32
    return %arg1, %c0_i32, %c0_i32_0 : i32, i32, i32
  }
  func.func @transform_6(%arg0: i32, %arg1: i32) -> (i32, i32, i32) {
    %c0_i32 = arith.constant 0 : i32
    %c0_i32_0 = arith.constant 0 : i32
    %c0_i32_1 = arith.constant 0 : i32
    return %arg1, %c0_i32, %c0_i32_0 : i32, i32, i32
  }
  func.func @transform_7(%arg0: i32, %arg1: i32) -> (i32, i32, i32) {
    %c0_i32 = arith.constant 0 : i32
    %c0_i32_0 = arith.constant 0 : i32
    %c0_i32_1 = arith.constant 0 : i32
    return %arg1, %c0_i32, %c0_i32_0 : i32, i32, i32
  }
  func.func @transform_8(%arg0: i32, %arg1: i32) -> (i32, i32) {
    %c0_i32 = arith.constant 0 : i32
    %c0_i32_0 = arith.constant 0 : i32
    %c0_i32_1 = arith.constant 0 : i32
    return %c0_i32, %c0_i32_0 : i32, i32
  }
  func.func @transform_9(%arg0: i32, %arg1: i32) -> (i32, i32) {
    %c0_i32 = arith.constant 0 : i32
    %c0_i32_0 = arith.constant 0 : i32
    %c0_i32_1 = arith.constant 0 : i32
    return %c0_i32, %c0_i32_0 : i32, i32
  }
  func.func @transform_10(%arg0: i32, %arg1: i32) -> (i32, i32) {
    %c0_i32 = arith.constant 0 : i32
    %c0_i32_0 = arith.constant 0 : i32
    %c0_i32_1 = arith.constant 0 : i32
    return %c0_i32, %c0_i32_0 : i32, i32
  }
  func.func @transform_11(%arg0: i32, %arg1: i32) -> (i32, i32, i32) {
    %c0_i32 = arith.constant 0 : i32
    %c0_i32_0 = arith.constant 0 : i32
    %c0_i32_1 = arith.constant 0 : i32
    return %arg0, %c0_i32, %c0_i32_0 : i32, i32, i32
  }
}

</mosaic_0001>

<bundles_post_ra>
// kernel: tpu_custom_call.1
= control target key start
LH: loop header
LB: loop body
LE: loop exit
PB: predicated region body
PF: predicated region fallthrough
CT: control target
= control target key end

     0   :  { %s4243_s0 = inlined_call_operand.hbm [shape: f32[2,8,32], index: 0, kind: input, shape index: {}]   ;;  %s4244_s1 = inlined_call_operand.hbm [shape: f32[1,8,32], index: 1, kind: input, shape index: {}]   ;;  %s4245_s2 = inlined_call_operand.hbm [shape: f32[2,8,1], index: 2, kind: input, shape index: {}]   ;;  %s4246_s3 = inlined_call_operand.hbm [shape: f32[2,8,128], index: 3, kind: input, shape index: {}]   ;;  %s4247_s4 = inlined_call_operand.hbm [shape: bf16[2,32,96], index: 4, kind: input, shape index: {}]   ;;  %s4248_s5 = inlined_call_operand.hbm [shape: bf16[2,32,32], index: 5, kind: input, shape index: {}]   ;;  %s4249_s6 = inlined_call_operand.hbm [shape: bf16[2,32,128], index: 6, kind: input, shape index: {}]   ;;  %s4250_s7 = inlined_call_operand.hbm [shape: bf16[2,128,32], index: 7, kind: input, shape index: {}]   ;;  %s4251_s8 = inlined_call_operand.hbm [shape: f32[1,32], index: 8, kind: input, shape index: {}]   ;;  %s4252_s9 = inlined_call_operand.hbm [shape: f32[1,32], index: 9, kind: input, shape index: {}]   ;;  %s4253_s10 = inlined_call_operand.hbm [shape: bf16[32,32], index: 10, kind: input, shape index: {}]   ;;  %s4254_s11 = inlined_call_operand.hbm [shape: f32[2,1,32], index: 11, kind: output, shape index: {}]  }
   0x1   :  { %4279 = sst [smem:[#allocation38_spill]] %s4244_s1 }
   0x2   :  { %4280 = sst [smem:[#allocation39_spill]] %s4246_s3 }
   0x3   :  { %4281 = sst [smem:[#allocation40_spill]] %s4248_s5 }
   0x4   :  { %4282 = sst [smem:[#allocation41_spill]] %s4251_s8 }
   0x5   :  { %4283 = sst [smem:[#allocation42_spill]] %s4252_s9 }
   0x6   :  { %4284 = sst [smem:[#allocation43_spill]] %s4254_s11 }
   0x7   :  { %16 = vsyncpa [#allocation4], 0 }
   0x8   :  { %17 = vsyncpa [#allocation7], 0 }
   0x9   :  { %18 = vsyncpa [#allocation10], 0 }
   0xa   :  { %20 = vsyncpa [#allocation10 + $0x1], 0 }
   0xb   :  { %21 = vsyncpa [#allocation13], 0 }
   0xc   :  { %23 = vsyncpa [#allocation13 + $0x1], 0 }
   0xd   :  { %24 = vsyncpa [#allocation16], 0 }
   0xe   :  { %26 = vsyncpa [#allocation16 + $0x1], 0 }
   0xf   :  { %27 = vsyncpa [#allocation19], 0 }
  0x10   :  { %28 = vsyncpa [#allocation5], 0  ;;  %s3479_s17 = smov 0   ;;  %s3481_s18 = smov 0  }
  0x11   :  { %s3483_s19 = smov 0   ;;  %s3485_s20 = smov 0  }
  0x12   :  { %s3487_s21 = smov 0   ;;  %s3489_s22 = smov 0  }
  0x13 LB: > { %4285 = sst [smem:[#allocation30_spill]] %s3364_s18  ;;  %s3382_s23 = smov [#allocation6]   ;;  %s3380_s22 = sphi %s3489_s22, %s34_s22   ;;  %s3376_s21 = sphi %s3487_s21, %s4340_s21   ;;  %s3372_s20 = sphi %s3485_s20, %s4339_s20   ;;  %s3368_s19 = sphi %s3483_s19, %s4337_s19   ;;  %s3364_s18 = sphi %s3481_s18, %s4336_s18   ;;  %s3360_s17 = sphi %s3479_s17, %s4335_s17  }
  0x14   : > { %4286 = sst [smem:[#allocation31_spill]] %s3368_s19  ;;  %s372_s24 = sshll.u32 %s3382_s23, 4  ;;  %s373_s24 = int_to_ptr.vmem [resolvable:$true] %s372_s24 }
  0x15   : > { %4287 = sst [smem:[#allocation32_spill]] %s3372_s20  ;;  %s3510_s25 = sadd.s32 4294967295, %s3380_s22  }
  0x16   : > { %4288 = sst [smem:[#allocation33_spill]] %s3380_s22  ;;  %p2423_p0 = scmp.ge.s32.totalorder %s3380_s22, 1 }
  0x17   : > { %p4256_p1 = scmp.eq.s32.totalorder %s3510_s25, 0  ;;  %p343_p2 = scmp.lt.s32.totalorder %s3380_s22, 3 }
  0x18   : > { %s3383_s27 = smov [#allocation17]   ;;  %s3384_s29 = smov [#allocation18]  }
  0x19   : > { %p3515_p3 = pnand %p2423_p0, %p343_p2  ;;  %s399_s28 = sshll.u32 %s3383_s27, 4  ;;  %s3521_s28 = int_to_ptr.vmem [resolvable:$true] %s399_s28 }
  0x1a   : > { %s410_s30 = sshll.u32 %s3384_s29, 4  ;;  %s4292_s1 = sld [smem:[#allocation38_spill]]  ;;  %s3529_s30 = int_to_ptr.vmem [resolvable:$true] %s410_s30 }
  0x1b   : > { %s4289_s26 = scalar_select %p3515_p3, 1, 0 }
  0x1c   : > { %p2746_p4 = pneg %p3515_p3 }
  0x1d   : > { %4290 = sst [smem:[#allocation34_spill]] %s4289_s26 }
  0x1e   : > { %p3525_p5 = pnand %p2746_p4, %p4256_p1 }
  0x20   : > { %s4291_s12 = scalar_select %p3525_p5, 1, 0 }
  0x21   : > { %s2958_s15 = scalar_lea.hbm %s4292_s1, 128  ;;  %p3539_p7 = pneg %p3525_p5 }
  0x22   : > { %p2959_p6 = scmp.ne.s32.totalorder %s4292_s1, %s2958_s15  ;;  %p2965_p10 = scmp.lt.u32.totalorder %s2958_s15, %s4292_s1 }
  0x23   : > { %s4293_s27 = scalar_select %p3539_p7, 1, 0 }
  0x24   : > { %p2961_p8 = pnand %p3539_p7, %p2959_p6 }
  0x26   : > { %p2962_p9 = pneg %p2961_p8 }
  0x28   : > { %p2967_p11 = pnand %p2965_p10, %p2962_p9 }
  0x2a   : > { %2970 = shalt.err (!%p2967_p11)
}
  0x2b   : > { %s2971_s13 = scalar_lea.vmem %s373_s24, 128  ;;  %p2979_p2 = scmp.lt.s32.totalorder %s373_s24, %s373_s24 }
  0x2c   : > { %p2972_p12 = scmp.ne.s32.totalorder %s373_s24, %s2971_s13  ;;  %p2980_p4 = scmp.lt.s32.totalorder %s2971_s13, %s2971_s13 }
  0x2e   : > { %p2974_p13 = pnand %p2972_p12, %p3539_p7  ;;  %p2981_p1 = por %p2980_p4, %p2979_p2 }
  0x30   : > { %p2975_p0 = pneg %p2974_p13 }
  0x32   : > { %p2982_p3 = pnand %p2981_p1, %p2975_p0 }
  0x34   : > { %2985 = shalt.err (!%p2982_p3)
}
  0x35   : > { %2752 = dma.hbm_to_vmem [thread:$0]  (!%p3525_p5), %s4292_s1, 128, %s373_s24, [#allocation7]  }
  0x36   : > { %s4294_s8 = sld [smem:[#allocation41_spill]] }
  0x3c   : > { %s2986_s23 = scalar_lea.hbm %s4294_s8, 16 }
  0x3d   : > { %p2987_p6 = scmp.ne.s32.totalorder %s4294_s8, %s2986_s23  ;;  %p2993_p1 = scmp.lt.u32.totalorder %s2986_s23, %s4294_s8 }
  0x3f   : > { %p2989_p8 = pnand %p2987_p6, %p3539_p7 }
  0x41   : > { %p2990_p9 = pneg %p2989_p8 }
  0x43   : > { %p2995_p3 = pnand %p2993_p1, %p2990_p9 }
  0x45   : > { %2998 = shalt.err (!%p2995_p3)
}
  0x46   : > { %s2999_s24 = scalar_lea.vmem %s3521_s28, 16  ;;  %s3006_s20 = scalar_lea.vmem %s3521_s28, 32 }
  0x47   : > { %p3000_p10 = scmp.ne.s32.totalorder %s3521_s28, %s2999_s24  ;;  %p3007_p13 = scmp.lt.s32.totalorder %s3521_s28, %s3521_s28 }
  0x48   : > { %p3008_p0 = scmp.lt.s32.totalorder %s3006_s20, %s2999_s24 }
  0x49   : > { %p3002_p11 = pnand %p3000_p10, %p3539_p7 }
  0x4a   : > { %p3009_p2 = por %p3008_p0, %p3007_p13 }
  0x4b   : > { %p3003_p12 = pneg %p3002_p11 }
  0x4d   : > { %p3010_p4 = pnand %p3009_p2, %p3003_p12 }
  0x4f   : > { %3013 = shalt.err (!%p3010_p4)
}
  0x50   : > { %2758 = dma.hbm_to_vmem [thread:$0]  (!%p3525_p5), %s4294_s8, 16, %s3521_s28, [#allocation16]  }
  0x51   : > { %s4295_s9 = sld [smem:[#allocation42_spill]] }
  0x57   : > { %s3014_s15 = scalar_lea.hbm %s4295_s9, 16 }
  0x58   : > { %p3015_p6 = scmp.ne.s32.totalorder %s4295_s9, %s3014_s15  ;;  %p3021_p1 = scmp.lt.u32.totalorder %s3014_s15, %s4295_s9 }
  0x5a   : > { %p3017_p8 = pnand %p3015_p6, %p3539_p7 }
  0x5c   : > { %p3018_p9 = pneg %p3017_p8 }
  0x5e   : > { %p3023_p3 = pnand %p3021_p1, %p3018_p9 }
  0x60   : > { %3026 = shalt.err (!%p3023_p3)
}
  0x61   : > { %s3027_s28 = scalar_lea.vmem %s3529_s30, 16  ;;  %s3034_s20 = scalar_lea.vmem %s3529_s30, 32 }
  0x62   : > { %p3028_p10 = scmp.ne.s32.totalorder %s3529_s30, %s3027_s28  ;;  %p3035_p13 = scmp.lt.s32.totalorder %s3529_s30, %s3529_s30 }
  0x63   : > { %p3036_p0 = scmp.lt.s32.totalorder %s3034_s20, %s3027_s28 }
  0x64   : > { %p3030_p11 = pnand %p3028_p10, %p3539_p7 }
  0x65   : > { %p3037_p2 = por %p3036_p0, %p3035_p13 }
  0x66   : > { %p3031_p12 = pneg %p3030_p11 }
  0x68   : > { %p3038_p4 = pnand %p3037_p2, %p3031_p12 }
  0x6a   : > { %3041 = shalt.err (!%p3038_p4)
}
  0x6b   : > { %2761 = dma.hbm_to_vmem [thread:$0]  (!%p3525_p5), %s4295_s9, 16, %s3529_s30, [#allocation19]  }
  0x6c   : > { %s43_s16 = sadd.s32 1, %s3376_s21  ;;  %s126_s11 = sadd.s32 1, %s3368_s19 }
  0x6d   : > { %p44_p6 = scmp.ge.s32.totalorder %s43_s16, 2  ;;  %p133_p8 = scmp.ne.s32.totalorder %s3368_s19, %s3364_s18 }
  0x6e   : > { %p134_p9 = scmp.eq.s32.totalorder %s3380_s22, 0  ;;  %p139_p3 = scmp.ne.s32.totalorder %s3364_s18, %s3360_s17 }
  0x6f   : > { %s4342_s16 = smov (%p44_p6, %s43_s16), 0  ;;  %p2787_p10 = scmp.lt.s32.totalorder %s3380_s22, 2 }
  0x70   : > { %4296 = sst [smem:[#allocation35_spill]] %s4342_s16  ;;  %p3610_p1 = por %p134_p9, %p133_p8 }
  0x71   : > { %s123_s23 = ssub.s32 %s3376_s21, %s4342_s16  ;;  %p4298_p12 = scmp.eq.s32.totalorder %s3510_s25, 0 }
  0x72   : > { %p124_p11 = scmp.eq.s32.totalorder %s123_s23, 0  ;;  %s3626_s29 = sand.u32 1, %s3380_s22  }
  0x73   : > { %p3621_p13 = por %p4298_p12, %p139_p3  ;;  %s3629_s13 = sand.u32 1, %s3368_s19  }
  0x74   : > { %s3632_s24 = scalar_select %p124_p11, %s3368_s19, %s126_s11  }
  0x75   : > { %s4299_s30 = scalar_select %p3621_p13, 1, 0 }
  0x76   : > { %4301 = sst [smem:[#allocation37_spill]] %s3632_s24  ;;  %s2431_s28 = sshll.u32 %s3629_s13, 3 }
  0x77   : > { %4300 = sst [smem:[#allocation36_spill]] %s4299_s30  ;;  %s2432_s20 = sshll.u32 %s3376_s21, 7 }
  0x78   : > { %s4302_s3 = sld [smem:[#allocation39_spill]]  ;;  %s438_s23 = scalar_lea.vmem [#allocation9], %s2431_s28 }
  0x79   : > { %s445_s1 = sshll.u32 %s438_s23, 4  ;;  %p3645_p0 = pnand %p2787_p10, %p3610_p1  ;;  %s3641_s1 = int_to_ptr.vmem [resolvable:$true] %s445_s1 }
  0x7a   : > { %s3650_s11 = sshll.u32 %s3629_s13, 4 }
  0x7b   : > { %s4303_s8 = scalar_select %p3645_p0, 1, 0 }
  0x7c   : > { %p3657_p4 = pneg %p3645_p0 }
  0x7e   : > { %s3639_s14 = scalar_lea.hbm %s4302_s3, %s2432_s20  ;;  %s3047_s26 = scalar_lea.hbm %s4302_s3, 256 }
  0x7f   : > { %s3042_s17 = scalar_lea.hbm %s3639_s14, 128  ;;  %p3048_p9 = scmp.lt.u32.totalorder %s3639_s14, %s4302_s3 }
  0x80   : > { %p3043_p2 = scmp.ne.s32.totalorder %s3639_s14, %s3042_s17  ;;  %p3049_p1 = scmp.lt.u32.totalorder %s3047_s26, %s3042_s17 }
  0x81   : > { %s4304_s20 = scalar_select %p3657_p4, 1, 0 }
  0x82   : > { %p3045_p6 = pnand %p3657_p4, %p3043_p2  ;;  %p3050_p3 = por %p3049_p1, %p3048_p9 }
  0x83   : > { %p3051_p10 = scmp.lt.u32.totalorder %s3042_s17, %s3639_s14 }
  0x84   : > { %p3046_p8 = pneg %p3045_p6 }
  0x85   : > { %p3052_p11 = por %p3051_p10, %p3050_p3 }
  0x87   : > { %p3053_p12 = pnand %p3052_p11, %p3046_p8 }
  0x89   : > { %3056 = shalt.err (!%p3053_p12)
}
  0x8a   : > { %s3057_s9 = scalar_lea.vmem %s3641_s1, 128  ;;  %s3385_s15 = smov [#allocation9]  }
  0x8b   : > { %p3058_p2 = scmp.ne.s32.totalorder %s3641_s1, %s3057_s9  ;;  %s3062_s28 = sshll.u32 %s3385_s15, 4  ;;  %s3063_s28 = int_to_ptr.vmem [resolvable:$false] %s3062_s28 }
  0x8c   : > { %s3064_s16 = scalar_lea.vmem %s3063_s28, 256  ;;  %p3065_p5 = scmp.lt.s32.totalorder %s3641_s1, %s3063_s28 }
  0x8d   : > { %p3060_p6 = pnand %p3058_p2, %p3657_p4  ;;  %p3066_p7 = scmp.lt.s32.totalorder %s3064_s16, %s3057_s9 }
  0x8f   : > { %p3061_p13 = pneg %p3060_p6  ;;  %p3067_p9 = por %p3066_p7, %p3065_p5 }
  0x91   : > { %p3068_p1 = pnand %p3067_p9, %p3061_p13 }
  0x93   : > { %3071 = shalt.err (!%p3068_p1)
}
  0x94   : > { %s4305_s17 = scalar_lea.sflag [#allocation10], %s3626_s29  ;;  %s456_s26 = scalar_lea.vmem [#allocation11], %s3650_s11 }
  0x95   : > { %2768 = dma.hbm_to_vmem [thread:$0]  (!%p3645_p0), %s3639_s14, 128, %s3641_s1, %s4305_s17  }
  0x96   : > { %s463_s23 = sshll.u32 %s456_s26, 4  ;;  %s498_s9 = scalar_lea.vmem [#allocation14], %s3650_s11  ;;  %s3683_s23 = int_to_ptr.vmem [resolvable:$true] %s463_s23 }
  0x97   : > { %s505_s15 = sshll.u32 %s498_s9, 4  ;;  %s2442_s28 = sshll.u32 %s3629_s13, 6  ;;  %s3686_s15 = int_to_ptr.vmem [resolvable:$true] %s505_s15 }
  0x98   : > { %s519_s16 = scalar_lea.vmem [#allocation15], %s2442_s28  ;;  %s3690_s24 = sshll.u32 %s3376_s21, 8 }
  0x99   : > { %s526_s3 = sshll.u32 %s519_s16, 4  ;;  %s4306_s5 = sld [smem:[#allocation40_spill]]  ;;  %s3692_s3 = int_to_ptr.vmem [resolvable:$true] %s526_s3 }
  0x9a   : > { %s477_s17 = scalar_lea.vmem [#allocation12], %s3650_s11  ;;  %s4272_s13 = scalar_lea.sflag [#allocation13], %s3626_s29 }
  0x9b   : > { %s484_s26 = sshll.u32 %s477_s17, 4  ;;  %s3701_s26 = int_to_ptr.vmem [resolvable:$true] %s484_s26 }
  0x9f   : > { %s3698_s14 = scalar_lea.hbm %s4306_s5, %s3690_s24  ;;  %s3077_s19 = scalar_lea.hbm %s4306_s5, 512 }
  0xa0   : > { %s3072_s9 = scalar_lea.hbm %s3698_s14, 256  ;;  %p3078_p8 = scmp.lt.u32.totalorder %s3698_s14, %s4306_s5 }
  0xa1   : > { %p3073_p5 = scmp.ne.s32.totalorder %s3698_s14, %s3072_s9  ;;  %p3079_p3 = scmp.lt.u32.totalorder %s3077_s19, %s3072_s9 }
  0xa2   : > { %p3081_p11 = scmp.lt.u32.totalorder %s3072_s9, %s3698_s14 }
  0xa3   : > { %p3075_p7 = pnand %p3073_p5, %p3657_p4  ;;  %p3080_p10 = por %p3079_p3, %p3078_p8 }
  0xa5   : > { %p3076_p13 = pneg %p3075_p7  ;;  %p3082_p12 = por %p3081_p11, %p3080_p10 }
  0xa7   : > { %p3083_p2 = pnand %p3082_p12, %p3076_p13 }
  0xa9   : > { %3086 = shalt.err (!%p3083_p2)
}
  0xaa   : > { %s3087_s11 = scalar_lea.vmem %s3701_s26, 256  ;;  %s3386_s17 = smov [#allocation12]  }
  0xab   : > { %p3088_p6 = scmp.ne.s32.totalorder %s3701_s26, %s3087_s11  ;;  %s3092_s28 = sshll.u32 %s3386_s17, 4  ;;  %s3093_s28 = int_to_ptr.vmem [resolvable:$false] %s3092_s28 }
  0xac   : > { %s3094_s22 = scalar_lea.vmem %s3093_s28, 512  ;;  %p3095_p5 = scmp.lt.s32.totalorder %s3701_s26, %s3093_s28 }
  0xad   : > { %p3090_p9 = pnand %p3088_p6, %p3657_p4  ;;  %p3096_p7 = scmp.lt.s32.totalorder %s3094_s22, %s3087_s11 }
  0xaf   : > { %p3091_p1 = pneg %p3090_p9  ;;  %p3097_p8 = por %p3096_p7, %p3095_p5 }
  0xb1   : > { %p3098_p3 = pnand %p3097_p8, %p3091_p1 }
  0xb3   : > { %3101 = shalt.err (!%p3098_p3)
}
  0xb4   : > { %s4273_s9 = smov 64   ;;  %s4275_s16 = smov 4  }
  0xb5   : > { %2774 = dma.hbm_to_vmem [thread:$0]  (!%p3645_p0), %s3698_s14, 256, %s3701_s26, %s4272_s13, %s4273_s9, %s4273_s9, %s4275_s16  }
  0xb6   : > { %s3389_s19 = smov [#allocation3]   ;;  %s3102_s28 = scalar_lea.hbm %s4243_s0, 256 }
  0xb7   : > { %s358_s1 = sshll.u32 %s3389_s19, 4  ;;  %p3103_p13 = scmp.ne.s32.totalorder %s4243_s0, %s3102_s28  ;;  %s359_s1 = int_to_ptr.vmem [resolvable:$true] %s358_s1 }
  0xb8   : > { %p4307_p10 = scmp.ne.s32.totalorder %s4293_s27, 0  ;;  %p3109_p2 = scmp.lt.u32.totalorder %s3102_s28, %s4243_s0 }
  0xba   : > { %p3105_p11 = pnand %p3103_p13, %p4307_p10 }
  0xbc   : > { %p3106_p12 = pneg %p3105_p11 }
  0xbe   : > { %p3111_p6 = pnand %p3109_p2, %p3106_p12 }
  0xc0   : > { %3114 = shalt.err (!%p3111_p6)
}
  0xc1   : > { %s3115_s14 = scalar_lea.vmem %s359_s1, 256  ;;  %p3123_p7 = scmp.lt.s32.totalorder %s359_s1, %s359_s1 }
  0xc2   : > { %p3116_p9 = scmp.ne.s32.totalorder %s359_s1, %s3115_s14  ;;  %p3124_p8 = scmp.lt.s32.totalorder %s3115_s14, %s3115_s14 }
  0xc4   : > { %p3118_p1 = pnand %p3116_p9, %p4307_p10  ;;  %p3125_p3 = por %p3124_p8, %p3123_p7 }
  0xc6   : > { %p3119_p5 = pneg %p3118_p1 }
  0xc8   : > { %p3126_p0 = pnand %p3125_p3, %p3119_p5 }
  0xca   : > { %3129 = shalt.err (!%p3126_p0)
}
  0xcb   : > { %s3390_s5 = smov 128   ;;  %s3391_s26 = smov 8  }
  0xcc   : > { %p4308_p13 = scmp.ne.s32.totalorder %s4291_s12, 0  ;;  %s3392_s19 = smov [#allocation8]  }
  0xcd   : > { %s385_s11 = sshll.u32 %s3392_s19, 4  ;;  %s3393_s17 = smov [#allocation20]   ;;  %s386_s11 = int_to_ptr.vmem [resolvable:$true] %s385_s11 }
  0xce   : > { %2749 = dma.hbm_to_vmem [thread:$0]  (!%p4308_p13), %s4243_s0, 256, %s359_s1, [#allocation4], %s3390_s5, %s3390_s5, %s3391_s26  }
  0xcf   : > { %s420_s28 = sshll.u32 %s3393_s17, 4  ;;  %s3130_s13 = scalar_lea.hbm %s4245_s2, 256  ;;  %s3748_s28 = int_to_ptr.vmem [resolvable:$true] %s420_s28 }
  0xd0   : > { %p3131_p0 = scmp.ne.s32.totalorder %s4245_s2, %s3130_s13  ;;  %p3137_p2 = scmp.lt.u32.totalorder %s3130_s13, %s4245_s2 }
  0xd2   : > { %p3133_p11 = pnand %p3131_p0, %p4307_p10 }
  0xd4   : > { %p3134_p12 = pneg %p3133_p11 }
  0xd6   : > { %p3139_p6 = pnand %p3137_p2, %p3134_p12 }
  0xd8   : > { %3142 = shalt.err (!%p3139_p6)
}
  0xd9   : > { %s3143_s30 = scalar_lea.vmem %s386_s11, 256  ;;  %p3151_p7 = scmp.lt.s32.totalorder %s386_s11, %s386_s11 }
  0xda   : > { %p3144_p9 = scmp.ne.s32.totalorder %s386_s11, %s3143_s30  ;;  %p3152_p8 = scmp.lt.s32.totalorder %s3143_s30, %s3143_s30 }
  0xdc   : > { %p3146_p1 = pnand %p3144_p9, %p4307_p10  ;;  %p3153_p3 = por %p3152_p8, %p3151_p7 }
  0xde   : > { %p3147_p5 = pneg %p3146_p1 }
  0xe0   : > { %p3154_p4 = pnand %p3153_p3, %p3147_p5 }
  0xe2   : > { %3157 = shalt.err (!%p3154_p4)
}
  0xe3   : > { %2755 = dma.hbm_to_vmem [thread:$0]  (!%p4308_p13), %s4245_s2, 256, %s386_s11, [#allocation7], %s3390_s5, %s3390_s5, %s3391_s26  }
  0xe4   : > { %s3158_s17 = scalar_lea.hbm %s4253_s10, 256 }
  0xe5   : > { %p3159_p0 = scmp.ne.s32.totalorder %s4253_s10, %s3158_s17  ;;  %p3165_p4 = scmp.lt.u32.totalorder %s3158_s17, %s4253_s10 }
  0xe7   : > { %p3161_p11 = pnand %p3159_p0, %p4307_p10 }
  0xe9   : > { %p3162_p12 = pneg %p3161_p11 }
  0xeb   : > { %p3167_p2 = pnand %p3165_p4, %p3162_p12 }
  0xed   : > { %3170 = shalt.err (!%p3167_p2)
}
  0xee   : > { %s3171_s5 = scalar_lea.vmem %s3748_s28, 256  ;;  %p3179_p5 = scmp.lt.s32.totalorder %s3748_s28, %s3748_s28 }
  0xef   : > { %p3172_p6 = scmp.ne.s32.totalorder %s3748_s28, %s3171_s5  ;;  %p3180_p7 = scmp.lt.s32.totalorder %s3171_s5, %s3171_s5 }
  0xf1   : > { %p3174_p9 = pnand %p3172_p6, %p4307_p10  ;;  %p3181_p8 = por %p3180_p7, %p3179_p5 }
  0xf3   : > { %p3175_p1 = pneg %p3174_p9 }
  0xf5   : > { %p3182_p3 = pnand %p3181_p8, %p3175_p1 }
  0xf7   : > { %3185 = shalt.err (!%p3182_p3)
}
  0xf8   : > { %s4309_s26 = smov 4   ;;  %s4310_s11 = smov 64  }
  0xf9   : > { %2764 = dma.hbm_to_vmem [thread:$0]  (!%p4308_p13), %s4253_s10, 256, %s3748_s28, [#allocation19], %s4310_s11, %s4310_s11, %s4309_s26  }
  0xfa   : > { %s3798_s13 = scalar_lea.hbm %s4247_s4, %s3690_s24  ;;  %s3804_s12 = scalar_lea.hbm %s4249_s6, %s3690_s24 }
  0xfb   : > { %s3186_s22 = scalar_lea.hbm %s3798_s13, 256  ;;  %p4311_p0 = scmp.ne.s32.totalorder %s4304_s20, 0 }
  0xfc   : > { %p3187_p10 = scmp.ne.s32.totalorder %s3798_s13, %s3186_s22  ;;  %s3191_s18 = scalar_lea.hbm %s4247_s4, 512 }
  0xfd   : > { %p3192_p13 = scmp.lt.u32.totalorder %s3798_s13, %s4247_s4  ;;  %p3193_p4 = scmp.lt.u32.totalorder %s3191_s18, %s3186_s22 }
  0xfe   : > { %p3189_p11 = pnand %p3187_p10, %p4311_p0  ;;  %p3195_p6 = scmp.lt.u32.totalorder %s3186_s22, %s3798_s13 }
  0xff   : > { %p3194_p2 = por %p3193_p4, %p3192_p13 }
 0x100   : > { %p3190_p12 = pneg %p3189_p11 }
 0x101   : > { %p3196_p9 = por %p3195_p6, %p3194_p2 }
 0x103   : > { %p3197_p1 = pnand %p3196_p9, %p3190_p12 }
 0x105   : > { %3200 = shalt.err (!%p3197_p1)
}
 0x106   : > { %s3201_s24 = scalar_lea.vmem %s3683_s23, 256  ;;  %s3394_s30 = smov [#allocation11]  }
 0x107   : > { %p3202_p5 = scmp.ne.s32.totalorder %s3683_s23, %s3201_s24  ;;  %s3206_s9 = sshll.u32 %s3394_s30, 4  ;;  %s3207_s9 = int_to_ptr.vmem [resolvable:$false] %s3206_s9 }
 0x108   : > { %s3208_s27 = scalar_lea.vmem %s3207_s9, 512  ;;  %p3209_p3 = scmp.lt.s32.totalorder %s3683_s23, %s3207_s9 }
 0x109   : > { %p3204_p7 = pnand %p3202_p5, %p4311_p0  ;;  %p3210_p10 = scmp.lt.s32.totalorder %s3208_s27, %s3201_s24 }
 0x10b   : > { %p3205_p8 = pneg %p3204_p7  ;;  %p3211_p11 = por %p3210_p10, %p3209_p3 }
 0x10d   : > { %p3212_p13 = pnand %p3211_p11, %p3205_p8 }
 0x10f   : > { %3215 = shalt.err (!%p3212_p13)
}
 0x110   : > { %p4312_p12 = scmp.ne.s32.totalorder %s4303_s8, 0  ;;  %s4313_s16 = scalar_lea.sflag [#allocation10], %s3626_s29 }
 0x111   : > { %s3216_s19 = scalar_lea.hbm %s3804_s12, 256  ;;  %s3221_s28 = scalar_lea.hbm %s4249_s6, 512 }
 0x112   : > { %2771 = dma.hbm_to_vmem [thread:$0]  (!%p4312_p12), %s3798_s13, 256, %s3683_s23, %s4313_s16, %s4310_s11, %s4310_s11, %s4309_s26  }
 0x113   : > { %p3217_p4 = scmp.ne.s32.totalorder %s3804_s12, %s3216_s19  ;;  %p3222_p9 = scmp.lt.u32.totalorder %s3804_s12, %s4249_s6 }
 0x114   : > { %p3223_p1 = scmp.lt.u32.totalorder %s3221_s28, %s3216_s19  ;;  %p3225_p7 = scmp.lt.u32.totalorder %s3216_s19, %s3804_s12 }
 0x115   : > { %p3219_p2 = pnand %p3217_p4, %p4311_p0 }
 0x116   : > { %p3224_p5 = por %p3223_p1, %p3222_p9 }
 0x117   : > { %p3220_p6 = pneg %p3219_p2 }
 0x118   : > { %p3226_p8 = por %p3225_p7, %p3224_p5 }
 0x11a   : > { %p3227_p3 = pnand %p3226_p8, %p3220_p6 }
 0x11c   : > { %3230 = shalt.err (!%p3227_p3)
}
 0x11d   : > { %s3231_s23 = scalar_lea.vmem %s3686_s15, 256  ;;  %s3395_s13 = smov [#allocation14]  }
 0x11e   : > { %p3232_p10 = scmp.ne.s32.totalorder %s3686_s15, %s3231_s23  ;;  %s3236_s1 = sshll.u32 %s3395_s13, 4  ;;  %s3237_s1 = int_to_ptr.vmem [resolvable:$false] %s3236_s1 }
 0x11f   : > { %s3238_s5 = scalar_lea.vmem %s3237_s1, 512  ;;  %p3239_p4 = scmp.lt.s32.totalorder %s3686_s15, %s3237_s1 }
 0x120   : > { %p3234_p11 = pnand %p3232_p10, %p4311_p0  ;;  %p3240_p2 = scmp.lt.s32.totalorder %s3238_s5, %s3231_s23 }
 0x122   : > { %p3235_p13 = pneg %p3234_p11  ;;  %p3241_p9 = por %p3240_p2, %p3239_p4 }
 0x124   : > { %p3242_p1 = pnand %p3241_p9, %p3235_p13 }
 0x126   : > { %3245 = shalt.err (!%p3242_p1)
}
 0x127   : > { %s4314_s24 = scalar_lea.sflag [#allocation13], %s3626_s29  ;;  %s2506_s30 = sshll.u32 %s3376_s21, 10 }
 0x128   : > { %2777 = dma.hbm_to_vmem [thread:$0]  (!%p4312_p12), %s3804_s12, 256, %s3686_s15, %s4314_s24, %s4310_s11, %s4310_s11, %s4309_s26  }
 0x129   : > { %s3862_s16 = scalar_lea.hbm %s4250_s7, %s2506_s30  ;;  %s516_s19 = scalar_lea.sflag [#allocation16], %s3626_s29 }
 0x12a   : > { %s3246_s17 = scalar_lea.hbm %s3862_s16, 1024  ;;  %s3251_s15 = scalar_lea.hbm %s4250_s7, 2048 }
 0x12b   : > { %p3247_p6 = scmp.ne.s32.totalorder %s3862_s16, %s3246_s17  ;;  %p3252_p8 = scmp.lt.u32.totalorder %s3862_s16, %s4250_s7 }
 0x12c   : > { %p3253_p3 = scmp.lt.u32.totalorder %s3251_s15, %s3246_s17  ;;  %p3255_p11 = scmp.lt.u32.totalorder %s3246_s17, %s3862_s16 }
 0x12d   : > { %p3249_p5 = pnand %p3247_p6, %p4311_p0 }
 0x12e   : > { %p3254_p10 = por %p3253_p3, %p3252_p8 }
 0x12f   : > { %p3250_p7 = pneg %p3249_p5 }
 0x130   : > { %p3256_p13 = por %p3255_p11, %p3254_p10 }
 0x132   : > { %p3257_p4 = pnand %p3256_p13, %p3250_p7 }
 0x134   : > { %3260 = shalt.err (!%p3257_p4)
}
 0x135   : > { %s3261_s18 = scalar_lea.vmem %s3692_s3, 1024  ;;  %s3396_s23 = smov [#allocation15]  }
 0x136   : > { %p3262_p2 = scmp.ne.s32.totalorder %s3692_s3, %s3261_s18  ;;  %s3266_s13 = sshll.u32 %s3396_s23, 4  ;;  %s3267_s13 = int_to_ptr.vmem [resolvable:$false] %s3266_s13 }
 0x137   : > { %s3268_s1 = scalar_lea.vmem %s3267_s13, 2048  ;;  %p3269_p6 = scmp.lt.s32.totalorder %s3692_s3, %s3267_s13 }
 0x138   : > { %p3264_p9 = pnand %p3262_p2, %p4311_p0  ;;  %p3270_p5 = scmp.lt.s32.totalorder %s3268_s1, %s3261_s18 }
 0x13a   : > { %p3265_p1 = pneg %p3264_p9  ;;  %p3271_p8 = por %p3270_p5, %p3269_p6 }
 0x13c   : > { %p3272_p3 = pnand %p3271_p8, %p3265_p1 }
 0x13e   : > { %3275 = shalt.err (!%p3272_p3)
}
 0x13f   : > { %2780 = dma.hbm_to_vmem [thread:$0]  (!%p4312_p12), %s3862_s16, 1024, %s3692_s3, %s516_s19, %s4310_s11, %s4310_s11, %s4309_s26  }
 0x140   : > { %s4315_s20 = sld [smem:[#allocation34_spill]] }
 0x146   : > { %p4316_p0 = scmp.ne.s32.totalorder %s4315_s20, 0 }
 0x147   : > { %p4317_p7 = scmp.eq.s32.totalorder (!%p4316_p0), %s3510_s25, 0 }
 0x148   : > { %538 = sbr.rel (%p4316_p0) target bundleno = 5129 (0x1409), region = 64 }
 0x14f   : > { %3327 = dma.done.wait (%p4317_p7), [#allocation4], 256   ;;  %p4318_p10 = pmov %p4317_p7 }
 0x150   : > { %p4319_p11 = pmov %p4317_p7 }
 0x151   : > { %3329 = vsyncadd (%p4318_p10), [#allocation4], 4294967040 }
 0x152   : > { %3331 = dma.done.wait (%p4319_p11), [#allocation7], 384   ;;  %p4320_p13 = pmov %p4317_p7 }
 0x153   : > { %s4321_s8 = sld [smem:[#allocation30_spill]]  ;;  %s4322_s29 = sld [smem:[#allocation36_spill]] }
 0x154   : > { %3333 = vsyncadd (%p4320_p13), [#allocation7], 4294966912  ;;  %s552_s5 = sand.u32 1, %s3510_s25  }
 0x155   : > { %s553_s11 = scalar_lea.sflag [#allocation10], %s552_s5 }
 0x159   : > { %s554_s3 = sand.u32 1, %s4321_s8   ;;  %p4323_p12 = scmp.ne.s32.totalorder %s4322_s29, 0 }
 0x15a   : > { %s2449_s26 = sshll.u32 %s554_s3, 3 }
 0x15b   : > { %s3903_s24 = scalar_lea.vmem [#allocation9], %s2449_s26 }
 0x15c   : > { %3335 = dma.done.wait (%p4323_p12), %s553_s11, 384  }
 0x15d   : > { %3337 = vsyncadd (%p4323_p12), %s553_s11, 4294966912  ;;  %s3909_s30 = sshll.u32 %s554_s3, 4  ;;  %s571_s27 = scalar_lea.sflag [#allocation13], %s552_s5 }
 0x15e   : > { %s565_s9 = scalar_lea.vmem [#allocation11], %s3909_s30  ;;  %s574_s16 = scalar_lea.vmem [#allocation12], %s3909_s30 }
 0x15f   : > { %3339 = dma.done.wait (%p4323_p12), %s571_s27, 512  }
 0x160   : > { %3341 = vsyncadd (%p4323_p12), %s571_s27, 4294966784  ;;  %s2453_s19 = sshll.u32 %s554_s3, 6  ;;  %s583_s17 = scalar_lea.vmem [#allocation14], %s3909_s30 }
 0x161   : > { %s589_s22 = scalar_lea.sflag [#allocation16], %s552_s5  ;;  %s3918_s28 = scalar_lea.vmem [#allocation15], %s2453_s19 }
 0x162   : > { %3343 = dma.done.wait (%p4323_p12), %s589_s22, 1024  }
 0x163   : > { %3345 = vsyncadd (%p4323_p12), %s589_s22, 4294966272  ;;  %p4324_p4 = pmov %p4317_p7 }
 0x165   : > { %3347 = dma.done.wait (%p4324_p4), [#allocation16], 16   ;;  %p4325_p2 = pmov %p4324_p4 }
 0x167   : > { %3349 = vsyncadd (%p4325_p2), [#allocation16], 4294967280  ;;  %p4326_p9 = pmov %p4325_p2 }
 0x168   : > { %p4327_p1 = pmov %p4325_p2 }
 0x169   : > { %3351 = dma.done.wait (%p4326_p9), [#allocation19], 272  }
 0x16a   : > { %3353 = vsyncadd (%p4327_p1), [#allocation19], 4294967024  ;;  %s4328_s15 = sld [smem:[#allocation32_spill]] }
 0x170   : > { %p2457_p6 = scmp.ne.s32.totalorder %s4328_s15, 0 }
 0x171   : > { %v666_v0 = vld [vmem:[#allocation3] sm:$0xff] (!%p2457_p6)  ;;  %v668_v1 = vld [vmem:[#allocation6] sm:$0xff] (!%p2457_p6)  ;;  %vm671_vm0 = vcmask (!%p2457_p6), 261120   ;;  %v667_v2 = vld [vmem:[#allocation3 + $0x8] sm:$0xff] (!%p2457_p6) }
 0x172   : > { %665 = sbr.rel (%p2457_p6) target bundleno = 377 (0x179), region = 112  ;;  %v669_v3 = vadd.f32 (!%p2457_p6), %v668_v1, %v666_v0  ;;  %v670_v4 = vadd.f32 (!%p2457_p6), %v668_v1, %v667_v2 }
 0x174   : > { %672 = vst.msk [vmem:[#allocation2] sm:$0xff] (!%p2457_p6), %vm671_vm0, %v669_v3  ;;  %673 = vst.msk [vmem:[#allocation2 + $0x8] sm:$0xff] (!%p2457_p6), %vm671_vm0, %v670_v4 }
 0x179 PF: > { %vm677_vm1 = vcmask 261120   ;;  %v2891_v19 = vld [vmem:[%s565_s9] sm:$0xff]   ;;  %v3397_v20 = vmov 0.0   ;;  %v2892_v21 = vld [vmem:[%s565_s9 + $0x8] sm:$0xff]   ;;  %vm3398_vm2 = vmmov 0   ;;  %v705_v26 = vlaneseq  ;;  %s3399_s12 = smov 96  }
 0x17a   : > { %2560 = vmatprep.subr.bf16.mxu0 %v3397_v20  ;;  %2580 = vmatprep.subr.bf16.mxu1 %v3397_v20  ;;  %v3961_v31 = vld [vmem:[%s3903_s24] sm:$0xff]  ;;  %vm792_vm3 = vcmask 64512   ;;  %s3400_s14 = smov 64   ;;  %s3401_s18 = smov 88   ;;  %vm923_vm5 = vcmask 1043456   ;;  %vm1713_vm6 = vcmask 130048  }
 0x17b   : > { %v3933_v5 = vld [vmem:[#allocation2] sm:$0xff]  ;;  %v3935_v6 = vld [vmem:[#allocation2 + $0x8] sm:$0xff]  ;;  %2561 = vmatpush3.bf16.msra.mxu0 %v2891_v19  ;;  %2564 = vmatprep.mubr.msk.bf16.mxu0 %vm3398_vm2, %v3397_v20  ;;  %v3957_v29 = vshrl.u32 %v705_v26, 7  ;;  %v785_v58 = vand.u32 127, %v705_v26  ;;  %s3402_s23 = smov 120   ;;  %s3403_s13 = smov 56  }
 0x17c   : > { %v678_v7 = vsel %vm677_vm1, %v3933_v5, 0.0  ;;  %v681_v8 = vsel %vm677_vm1, %v3935_v6, 0.0  ;;  %2562 = vmatprep.subr.bf16.mxu0 %v3397_v20  ;;  %2582 = vmatprep.mubr.msk.bf16.mxu1 %vm3398_vm2, %v3397_v20  ;;  %s3404_s1 = smov 80   ;;  %s3405_s20 = smov 112   ;;  %vm1716_vm7 = vcmask 195584  }
 0x17d   : > { %679 = vadd.xlane.f32.xlu0 %v678_v7  ;;  %v707_v30 = vsub.s32 0, %v3957_v29  ;;  %v713_v35 = vsub.s32 1, %v3957_v29  ;;  %v724_v44 = vsub.s32 6, %v3957_v29  ;;  %vm3990_vm4 = vcmp.le.s32.totalorder %v785_v58, %v3957_v29  ;;  %s3406_s8 = smov 48   ;;  %s3407_s29 = smov 72  }
 0x17e   : > { %s3408_s5 = smov 104   ;;  %s3409_s3 = smov 40  }
 0x17f   : > { %2563 = vmatpush3.bf16.msra.mxu0 %v2892_v21  ;;  %v708_v34 = vrot.slane %v3961_v31, %v707_v30  ;;  %v714_v39 = vrot.slane %v3961_v31, %v713_v35  ;;  %v725_v45 = vrot.slane %v3961_v31, %v724_v44  ;;  %s3410_s26 = smov 8   ;;  %s3411_s11 = smov 16  }
 0x180   : > { %2568 = vmatprep.subr.bf16.mxu0 %v3397_v20  ;;  %s3412_s24 = smov 24   ;;  %s4331_s30 = sld [smem:[#allocation32_spill]] }
 0x181   : > { %682 = vadd.xlane.f32.xlu0 %v681_v8 }
 0x186   : > { %p2493_p5 = scmp.ne.s32.totalorder %s4331_s30, 1 }
 0x187   : > { %vm2055_vm8 = vcmask (!%p2493_p5), 1041409   ;;  %vm2058_vm9 = vcmask (!%p2493_p5), 254976   ;;  %vm3415_vm10 = vmmov (!%p2493_p5), 0   ;;  %vm2197_vm11 = vcmask (!%p2493_p5), 253952  }
 0x20a   : > { %v680_v9 = vpop.xlane.xlu0 %679 }
 0x20b   : > { %v685_v10 = vmul.f32 0.03125, %v680_v9 }
 0x20d   : > { %v687_v11 = vsub.f32 %v3933_v5, %v685_v10 }
 0x20e   : > { %v683_v12 = vpop.xlane.xlu0 %682 }
 0x20f   : > { %v686_v13 = vmul.f32 0.03125, %v683_v12  ;;  %v689_v14 = vmul.f32 %v687_v11, %v687_v11 }
 0x211   : > { %v688_v15 = vsub.f32 %v3935_v6, %v686_v13  ;;  %v691_v16 = vsel %vm677_vm1, %v689_v14, 0.0 }
 0x212   : > { %692 = vadd.xlane.f32.xlu1 %v691_v16 }
 0x213   : > { %v690_v17 = vmul.f32 %v688_v15, %v688_v15 }
 0x215   : > { %v694_v18 = vsel %vm677_vm1, %v690_v17, 0.0 }
 0x216   : > { %695 = vadd.xlane.f32.xlu1 %v694_v18 }
 0x29f   : > { %v693_v22 = vpop.xlane.xlu1 %692 }
 0x2a0   : > { %v697_v23 = vmul.f32 0.03125, %v693_v22 }
 0x2a2   : > { %v699_v24 = vadd.f32 1e-05, %v697_v23 }
 0x2a3   : > { %v696_v25 = vpop.xlane.xlu1 %695 }
 0x2a4   : > { %2905 = vrsqrt.f32 %v699_v24  ;;  %v698_v27 = vmul.f32 0.03125, %v696_v25 }
 0x2a6   : > { %v700_v28 = vadd.f32 1e-05, %v698_v27 }
 0x2a8   : > { %2907 = vrsqrt.f32 %v700_v28 }
 0x2ae   : > { %v2906_v32 = vpop.eup %2905 }
 0x2af   : > { %v703_v33 = vmul.f32 %v2906_v32, %v687_v11 }
 0x2b1   : > { %v709_v38 = vmul.f32 %v708_v34, %v703_v33 }
 0x2b2   : > { %v2908_v36 = vpop.eup %2907 }
 0x2b3   : > { %v704_v37 = vmul.f32 %v2908_v36, %v688_v15  ;;  %v715_v41 = vadd.f32 %v714_v39, %v709_v38 }
 0x2b5   : > { %v710_v40 = vmul.f32 %v708_v34, %v704_v37 }
 0x2b7   : > { %v716_v42 = vadd.f32 %v714_v39, %v710_v40 }
 0x2b9   : > { %v717_v43 = vpack.c.bf16 %v716_v42, %v715_v41 }
 0x2bb   : > { %2565 = vmatmul.mubr.msk.bf16.vlgmr.msra.gmra.mrb[0].mxu0 %vm677_vm1, %v717_v43 }
 0x2bc   : > { %2570 = vmatprep.mubr.msk.bf16.mxu0 %vm3398_vm2, %v3397_v20 }
 0x38e   : > { %v775_v46 = vpop.f32.mrb[0].mxu0 }
 0x38f   : > { %v776_v47 = vadd.f32 %v775_v46, %v725_v45  ;;  %v2566_v48 = vpop.f32.mrb[1].mxu0 }
 0x390   : > { %v778_v49 = vpop.f32.mrb[2].mxu0 }
 0x391   : > { %v3971_v50 = vpack.c.bf16 %v776_v47, %v776_v47  ;;  %v779_v51 = vadd.f32 %v778_v49, %v725_v45  ;;  %v2567_v52 = vpop.f32.mrb[3].mxu0 }
 0x393   : > { %v3973_v53 = vpack.c.bf16 %v779_v51, %v779_v51  ;;  %790 = vrot.lane.b32.xlu0 %v3971_v50, %s3399_s12 }
 0x395   : > { %840 = vrot.lane.b32.xlu1 %v3973_v53, %s3399_s12 }
 0x405   : > { %v791_v54 = vpop.permute.xlu0 %790 }
 0x406   : > { %v797_v55 = vsel %vm792_vm3, %v791_v54, 0 }
 0x407   : > { %2569 = vmatpush3.bf16.xpose.msra.mxu0 %v797_v55  ;;  %v841_v56 = vpop.permute.xlu1 %840 }
 0x408   : > { %2574 = vmatprep.subr.bf16.mxu0 %v3397_v20  ;;  %v846_v57 = vsel %vm792_vm3, %v841_v56, 0 }
 0x40e   : > { %2571 = vmatmul.mubr.msk.bf16.vlgmr.msra.gmra.mrb[4].mxu0 %vm792_vm3, %v3971_v50 }
 0x40f   : > { %2575 = vmatpush3.bf16.xpose.msra.mxu0 %v846_v57  ;;  %2576 = vmatprep.mubr.msk.bf16.mxu0 %vm3398_vm2, %v3397_v20 }
 0x410   : > { %2586 = vmatprep.subr.bf16.mxu0 %v3397_v20 }
 0x416   : > { %2577 = vmatmul.mubr.msk.bf16.vlgmr.msra.gmra.mrb[8].mxu0 %vm792_vm3, %v3973_v53 }
 0x417   : > { %2588 = vmatprep.mubr.msk.bf16.mxu0 %vm3398_vm2, %v3397_v20 }
 0x4e1   : > { %v833_v59 = vpop.f32.mrb[4].mxu0 }
 0x4e2   : > { %v888_v61 = vmul.f32 0.35355338, %v833_v59  ;;  %v2572_v62 = vpop.f32.mrb[5].mxu0 }
 0x4e3   : > { %v836_v63 = vpop.f32.mrb[6].mxu0 }
 0x4e4   : > { %v2573_v0 = vpop.f32.mrb[7].mxu0  ;;  %v892_v1 = vsel %vm3990_vm4, %v888_v61, -1e+30 }
 0x4e5   : > { %v894_v2 = vsel %vm792_vm3, %v892_v1, -inf }
 0x4e6   : > { %895 = vmax.xlane.f32.xlu1 %v894_v2 }
 0x4e9   : > { %v882_v3 = vpop.f32.mrb[8].mxu0 }
 0x4ea   : > { %v889_v4 = vmul.f32 0.35355338, %v882_v3  ;;  %v2578_v7 = vpop.f32.mrb[9].mxu0 }
 0x4eb   : > { %v885_v8 = vpop.f32.mrb[10].mxu0 }
 0x4ec   : > { %v2579_v9 = vpop.f32.mrb[11].mxu0  ;;  %v893_v10 = vsel %vm3990_vm4, %v889_v4, -1e+30 }
 0x4ed   : > { %v897_v11 = vsel %vm792_vm3, %v893_v10, -inf }
 0x4ee   : > { %898 = vmax.xlane.f32.xlu0 %v897_v11 }
 0x4f7   : > { %967 = vrot.lane.b32.xlu1 %v3973_v53, %s3400_s14 }
 0x4fb   : > { %1017 = vrot.lane.b32.xlu1 %v3971_v50, %s3401_s18 }
 0x573   : > { %v896_v12 = vpop.xlane.xlu1 %895 }
 0x574   : > { %v900_v13 = vsub.f32 %v892_v1, %v896_v12 }
 0x576   : > { %v902_v14 = vmul.f32 1.442695, %v900_v13 }
 0x577   : > { %v968_v15 = vpop.permute.xlu1 %967 }
 0x578   : > { %2909 = vpow2.f32 %v902_v14  ;;  %v973_v16 = vsel %vm923_vm5, %v968_v15, 0 }
 0x579   : > { %2587 = vmatpush3.bf16.msra.mxu0 %v973_v16 }
 0x57a   : > { %2598 = vmatprep.subr.bf16.mxu0 %v3397_v20 }
 0x57b   : > { %v899_v17 = vpop.xlane.xlu0 %898  ;;  %v1018_v26 = vpop.permute.xlu1 %1017 }
 0x57c   : > { %v901_v18 = vsub.f32 %v893_v10, %v899_v17  ;;  %v1023_v35 = vsel %vm792_vm3, %v1018_v26, 0 }
 0x57e   : > { %v904_v19 = vmul.f32 1.442695, %v901_v18 }
 0x580   : > { %2911 = vpow2.f32 %v904_v19 }
 0x582   : > { %v2910_v21 = vpop.eup %2909 }
 0x583   : > { %v906_v22 = vsel %vm792_vm3, %v2910_v21, 0.0 }
 0x584   : > { %907 = vadd.xlane.f32.xlu0 %v906_v22 }
 0x58a   : > { %v2912_v23 = vpop.eup %2911 }
 0x58b   : > { %v909_v24 = vsel %vm792_vm3, %v2912_v23, 0.0 }
 0x58c   : > { %910 = vadd.xlane.f32.xlu1 %v909_v24 }
 0x59a   : > { %918 = vrot.lane.b32.xlu0 %v3971_v50, %s3400_s14 }
 0x59d   : > { %1067 = vrot.lane.b32.xlu1 %v3973_v53, %s3401_s18 }
 0x59e   : > { %1015 = vrot.lane.b32.xlu0 %v3971_v50, %s3402_s23 }
 0x5a1   : > { %1065 = vrot.lane.b32.xlu1 %v3973_v53, %s3402_s23 }
 0x611   : > { %v908_v25 = vpop.xlane.xlu0 %907 }
 0x612   : > { %2913 = vrcp.f32 %v908_v25 }
 0x615   : > { %v919_v27 = vpop.permute.xlu0 %918 }
 0x616   : > { %v925_v28 = vsel %vm923_vm5, %v919_v27, 0 }
 0x617   : > { %2581 = vmatpush3.bf16.msra.mxu1 %v925_v28 }
 0x618   : > { %2592 = vmatprep.subr.bf16.mxu1 %v3397_v20 }
 0x619   : > { %v911_v30 = vpop.xlane.xlu1 %910  ;;  %v1016_v40 = vpop.permute.xlu0 %1015 }
 0x61a   : > { %2915 = vrcp.f32 %v911_v30 }
 0x61c   : > { %v2914_v32 = vpop.eup %2913 }
 0x61d   : > { %v914_v33 = vmul.f32 %v2914_v32, %v2910_v21  ;;  %v1068_v38 = vpop.permute.xlu1 %1067 }
 0x61e   : > { %v1073_v41 = vsel %vm792_vm3, %v1068_v38, 0 }
 0x61f   : > { %v916_v34 = vpack.c.bf16 %v914_v33, %v914_v33 }
 0x621   : > { %2583 = vmatmul.mubr.msk.bf16.vlgmr.msra.gmra.mrb[0].mxu1 %vm792_vm3, %v916_v34  ;;  %v1066_v42 = vpop.permute.xlu1 %1065 }
 0x622   : > { %2593 = vmatpush3.bf16.xpose.msra.mxu1 %v1023_v35  ;;  %2594 = vmatprep.mubr.msk.bf16.mxu1 %vm3398_vm2, %v3397_v20 }
 0x623   : > { %2604 = vmatprep.subr.bf16.mxu1 %v3397_v20 }
 0x624   : > { %v2916_v36 = vpop.eup %2915 }
 0x625   : > { %v915_v37 = vmul.f32 %v2916_v36, %v2912_v23 }
 0x627   : > { %v917_v39 = vpack.c.bf16 %v915_v37, %v915_v37 }
 0x629   : > { %2589 = vmatmul.mubr.msk.bf16.vlgmr.msra.gmra.mrb[12].mxu0 %vm792_vm3, %v917_v39  ;;  %2595 = vmatmul.mubr.msk.bf16.vlgmr.msra.gmra.mrb[4].mxu1 %vm792_vm3, %v1016_v40 }
 0x62a   : > { %2599 = vmatpush3.bf16.xpose.msra.mxu0 %v1073_v41  ;;  %2600 = vmatprep.mubr.msk.bf16.mxu0 %vm3398_vm2, %v3397_v20 }
 0x62b   : > { %2610 = vmatprep.subr.bf16.mxu0 %v3397_v20  ;;  %2606 = vmatprep.mubr.msk.bf16.mxu1 %vm3398_vm2, %v3397_v20 }
 0x631   : > { %2601 = vmatmul.mubr.msk.bf16.vlgmr.msra.gmra.mrb[16].mxu0 %vm792_vm3, %v1066_v42 }
 0x632   : > { %2612 = vmatprep.mubr.msk.bf16.mxu0 %vm3398_vm2, %v3397_v20 }
 0x6f4   : > { %v4028_v43 = vpop.f32.mrb[0].mxu1 }
 0x6f5   : > { %v2584_v44 = vpop.f32.mrb[1].mxu1 }
 0x6f6   : > { %v964_v45 = vpop.f32.mrb[2].mxu1 }
 0x6f7   : > { %v2585_v46 = vpop.f32.mrb[3].mxu1 }
 0x6fc   : > { %v4030_v47 = vpop.f32.mrb[12].mxu0  ;;  %v1059_v48 = vpop.f32.mrb[4].mxu1 }
 0x6fd   : > { %v1115_v49 = vmul.f32 0.35355338, %v1059_v48  ;;  %v2590_v51 = vpop.f32.mrb[13].mxu0  ;;  %v2596_v52 = vpop.f32.mrb[5].mxu1 }
 0x6fe   : > { %v1012_v54 = vpop.f32.mrb[14].mxu0  ;;  %v1062_v55 = vpop.f32.mrb[6].mxu1 }
 0x6ff   : > { %v2591_v56 = vpop.f32.mrb[15].mxu0  ;;  %v2597_v57 = vpop.f32.mrb[7].mxu1  ;;  %v1117_v58 = vsel %vm3990_vm4, %v1115_v49, -1e+30 }
 0x700   : > { %v1119_v59 = vsel %vm792_vm3, %v1117_v58, -inf }
 0x701   : > { %1120 = vmax.xlane.f32.xlu0 %v1119_v59 }
 0x704   : > { %v1109_v61 = vpop.f32.mrb[16].mxu0 }
 0x705   : > { %v1116_v62 = vmul.f32 0.35355338, %v1109_v61  ;;  %v2602_v63 = vpop.f32.mrb[17].mxu0 }
 0x706   : > { %v1112_v0 = vpop.f32.mrb[18].mxu0 }
 0x707   : > { %v2603_v1 = vpop.f32.mrb[19].mxu0  ;;  %v1118_v2 = vsel %vm3990_vm4, %v1116_v62, -1e+30 }
 0x708   : > { %v1122_v3 = vsel %vm792_vm3, %v1118_v2, -inf }
 0x709   : > { %1123 = vmax.xlane.f32.xlu1 %v1122_v3 }
 0x71a   : > { %1191 = vrot.lane.b32.xlu1 %v3973_v53, %s3403_s13 }
 0x71e   : > { %1241 = vrot.lane.b32.xlu1 %v3971_v50, %s3404_s1 }
 0x722   : > { %1291 = vrot.lane.b32.xlu1 %v3973_v53, %s3404_s1 }
 0x726   : > { %1289 = vrot.lane.b32.xlu1 %v3973_v53, %s3405_s20 }
 0x78e   : > { %v1121_v4 = vpop.xlane.xlu0 %1120 }
 0x78f   : > { %v1125_v7 = vsub.f32 %v1117_v58, %v1121_v4 }
 0x791   : > { %v1127_v8 = vmul.f32 1.442695, %v1125_v7 }
 0x793   : > { %2917 = vpow2.f32 %v1127_v8 }
 0x796   : > { %v1124_v9 = vpop.xlane.xlu1 %1123 }
 0x797   : > { %v1126_v10 = vsub.f32 %v1118_v2, %v1124_v9 }
 0x799   : > { %v1129_v11 = vmul.f32 1.442695, %v1126_v10 }
 0x79a   : > { %v1192_v12 = vpop.permute.xlu1 %1191 }
 0x79b   : > { %2919 = vpow2.f32 %v1129_v11  ;;  %v1197_v13 = vsel %vm923_vm5, %v1192_v12, 0 }
 0x79c   : > { %2611 = vmatpush3.bf16.msra.mxu0 %v1197_v13 }
 0x79d   : > { %v2918_v14 = vpop.eup %2917  ;;  %2622 = vmatprep.subr.bf16.mxu0 %v3397_v20 }
 0x79e   : > { %v1131_v15 = vsel %vm792_vm3, %v2918_v14, 0.0  ;;  %v1242_v26 = vpop.permute.xlu1 %1241 }
 0x79f   : > { %1132 = vadd.xlane.f32.xlu0 %v1131_v15  ;;  %v1247_v32 = vsel %vm792_vm3, %v1242_v26, 0 }
 0x7a2   : > { %v1292_v30 = vpop.permute.xlu1 %1291 }
 0x7a3   : > { %v1297_v34 = vsel %vm792_vm3, %v1292_v30, 0 }
 0x7a5   : > { %v2920_v16 = vpop.eup %2919 }
 0x7a6   : > { %v1134_v17 = vsel %vm792_vm3, %v2920_v16, 0.0  ;;  %v1290_v36 = vpop.permute.xlu1 %1289 }
 0x7a7   : > { %1135 = vadd.xlane.f32.xlu0 %v1134_v17 }
 0x7bd   : > { %1143 = vrot.lane.b32.xlu0 %v3971_v50, %s3403_s13 }
 0x7c1   : > { %1239 = vrot.lane.b32.xlu0 %v3971_v50, %s3405_s20 }
 0x82c   : > { %v1133_v18 = vpop.xlane.xlu0 %1132 }
 0x82d   : > { %2921 = vrcp.f32 %v1133_v18 }
 0x834   : > { %v1136_v19 = vpop.xlane.xlu0 %1135 }
 0x835   : > { %2923 = vrcp.f32 %v1136_v19 }
 0x837   : > { %v2922_v21 = vpop.eup %2921 }
 0x838   : > { %v1139_v22 = vmul.f32 %v2922_v21, %v2918_v14  ;;  %v1144_v23 = vpop.permute.xlu0 %1143 }
 0x839   : > { %v1149_v24 = vsel %vm923_vm5, %v1144_v23, 0 }
 0x83a   : > { %2605 = vmatpush3.bf16.msra.mxu1 %v1149_v24  ;;  %v1141_v25 = vpack.c.bf16 %v1139_v22, %v1139_v22 }
 0x83b   : > { %2616 = vmatprep.subr.bf16.mxu1 %v3397_v20 }
 0x83c   : > { %v1240_v35 = vpop.permute.xlu0 %1239 }
 0x83d   : > { %2607 = vmatmul.mubr.msk.bf16.vlgmr.msra.gmra.mrb[8].mxu1 %vm792_vm3, %v1141_v25 }
 0x83e   : > { %2618 = vmatprep.mubr.msk.bf16.mxu1 %vm3398_vm2, %v3397_v20 }
 0x83f   : > { %v2924_v27 = vpop.eup %2923 }
 0x840   : > { %v1140_v28 = vmul.f32 %v2924_v27, %v2920_v16 }
 0x842   : > { %v1142_v33 = vpack.c.bf16 %v1140_v28, %v1140_v28 }
 0x843   : > { %2617 = vmatpush3.bf16.xpose.msra.mxu1 %v1247_v32 }
 0x844   : > { %2613 = vmatmul.mubr.msk.bf16.vlgmr.msra.gmra.mrb[20].mxu0 %vm792_vm3, %v1142_v33  ;;  %2628 = vmatprep.subr.bf16.mxu1 %v3397_v20 }
 0x845   : > { %2623 = vmatpush3.bf16.xpose.msra.mxu0 %v1297_v34  ;;  %2624 = vmatprep.mubr.msk.bf16.mxu0 %vm3398_vm2, %v3397_v20 }
 0x846   : > { %2634 = vmatprep.subr.bf16.mxu0 %v3397_v20 }
 0x84a   : > { %2619 = vmatmul.mubr.msk.bf16.vlgmr.msra.gmra.mrb[12].mxu1 %vm792_vm3, %v1240_v35 }
 0x84b   : > { %2630 = vmatprep.mubr.msk.bf16.mxu1 %vm3398_vm2, %v3397_v20 }
 0x84c   : > { %2625 = vmatmul.mubr.msk.bf16.vlgmr.msra.gmra.mrb[24].mxu0 %vm792_vm3, %v1290_v36 }
 0x84d   : > { %2636 = vmatprep.mubr.msk.bf16.mxu0 %vm3398_vm2, %v3397_v20 }
 0x910   : > { %v4066_v37 = vpop.f32.mrb[8].mxu1 }
 0x911   : > { %v2608_v38 = vpop.f32.mrb[9].mxu1 }
 0x912   : > { %v1188_v39 = vpop.f32.mrb[10].mxu1 }
 0x913   : > { %v2609_v40 = vpop.f32.mrb[11].mxu1 }
 0x917   : > { %v4068_v41 = vpop.f32.mrb[20].mxu0 }
 0x918   : > { %v2876_v42 = vpack.i.bf16 %v4068_v41, %v4066_v37  ;;  %v2614_v44 = vpop.f32.mrb[21].mxu0 }
 0x919   : > { %v1236_v45 = vpop.f32.mrb[22].mxu0 }
 0x91a   : > { %v2615_v46 = vpop.f32.mrb[23].mxu0 }
 0x91d   : > { %v1283_v48 = vpop.f32.mrb[12].mxu1 }
 0x91e   : > { %v1339_v49 = vmul.f32 0.35355338, %v1283_v48  ;;  %v2620_v51 = vpop.f32.mrb[13].mxu1 }
 0x91f   : > { %v1286_v52 = vpop.f32.mrb[14].mxu1  ;;  %v1333_v54 = vpop.f32.mrb[24].mxu0 }
 0x920   : > { %v1340_v55 = vmul.f32 0.35355338, %v1333_v54  ;;  %v2621_v56 = vpop.f32.mrb[15].mxu1  ;;  %v2626_v57 = vpop.f32.mrb[25].mxu0  ;;  %v1341_v58 = vsel %vm3990_vm4, %v1339_v49, -1e+30 }
 0x921   : > { %v1336_v59 = vpop.f32.mrb[26].mxu0  ;;  %v1343_v61 = vsel %vm792_vm3, %v1341_v58, -inf }
 0x922   : > { %1344 = vmax.xlane.f32.xlu0 %v1343_v61  ;;  %v2627_v62 = vpop.f32.mrb[27].mxu0  ;;  %v1342_v63 = vsel %vm3990_vm4, %v1340_v55, -1e+30 }
 0x923   : > { %v1346_v0 = vsel %vm792_vm3, %v1342_v63, -inf }
 0x924   : > { %1347 = vmax.xlane.f32.xlu1 %v1346_v0 }
 0x935   : > { %1415 = vrot.lane.b32.xlu1 %v3973_v53, %s3406_s8 }
 0x939   : > { %1465 = vrot.lane.b32.xlu1 %v3971_v50, %s3407_s29 }
 0x93d   : > { %1515 = vrot.lane.b32.xlu1 %v3973_v53, %s3407_s29 }
 0x941   : > { %1513 = vrot.lane.b32.xlu1 %v3973_v53, %s3408_s5 }
 0x9af   : > { %v1345_v1 = vpop.xlane.xlu0 %1344 }
 0x9b0   : > { %v1349_v2 = vsub.f32 %v1341_v58, %v1345_v1 }
 0x9b1   : > { %v1348_v3 = vpop.xlane.xlu1 %1347 }
 0x9b2   : > { %v1351_v4 = vmul.f32 1.442695, %v1349_v2  ;;  %v1350_v7 = vsub.f32 %v1342_v63, %v1348_v3 }
 0x9b4   : > { %2925 = vpow2.f32 %v1351_v4  ;;  %v1353_v8 = vmul.f32 1.442695, %v1350_v7 }
 0x9b5   : > { %v1416_v9 = vpop.permute.xlu1 %1415 }
 0x9b6   : > { %2927 = vpow2.f32 %v1353_v8  ;;  %v1421_v10 = vsel %vm923_vm5, %v1416_v9, 0 }
 0x9b7   : > { %2635 = vmatpush3.bf16.msra.mxu0 %v1421_v10 }
 0x9b8   : > { %2646 = vmatprep.subr.bf16.mxu0 %v3397_v20 }
 0x9b9   : > { %v1466_v21 = vpop.permute.xlu1 %1465 }
 0x9ba   : > { %v1471_v27 = vsel %vm792_vm3, %v1466_v21, 0  ;;  %v2894_v21 = vld [vmem:[%s574_s16 + $0x8] sm:$0xff]  }
 0x9bd   : > { %v1516_v26 = vpop.permute.xlu1 %1515 }
 0x9be   : > { %v2926_v11 = vpop.eup %2925  ;;  %v1521_v30 = vsel %vm792_vm3, %v1516_v26, 0 }
 0x9bf   : > { %v1355_v12 = vsel %vm792_vm3, %v2926_v11, 0.0 }
 0x9c0   : > { %v2928_v13 = vpop.eup %2927  ;;  %1356 = vadd.xlane.f32.xlu0 %v1355_v12 }
 0x9c1   : > { %v1358_v14 = vsel %vm792_vm3, %v2928_v13, 0.0  ;;  %v1514_v33 = vpop.permute.xlu1 %1513 }
 0x9c4   : > { %1359 = vadd.xlane.f32.xlu0 %v1358_v14 }
 0x9da   : > { %1367 = vrot.lane.b32.xlu0 %v3971_v50, %s3406_s8 }
 0x9de   : > { %1463 = vrot.lane.b32.xlu0 %v3971_v50, %s3408_s5 }
 0xa4d   : > { %v1357_v15 = vpop.xlane.xlu0 %1356 }
 0xa4e   : > { %2929 = vrcp.f32 %v1357_v15 }
 0xa51   : > { %v1360_v16 = vpop.xlane.xlu0 %1359 }
 0xa52   : > { %2931 = vrcp.f32 %v1360_v16 }
 0xa55   : > { %v1368_v17 = vpop.permute.xlu0 %1367 }
 0xa56   : > { %v1373_v18 = vsel %vm923_vm5, %v1368_v17, 0 }
 0xa57   : > { %2629 = vmatpush3.bf16.msra.mxu1 %v1373_v18 }
 0xa58   : > { %v2930_v19 = vpop.eup %2929  ;;  %2640 = vmatprep.subr.bf16.mxu1 %v3397_v20 }
 0xa59   : > { %v1363_v22 = vmul.f32 %v2930_v19, %v2926_v11  ;;  %v1464_v32 = vpop.permute.xlu0 %1463  ;;  %v2893_v19 = vld [vmem:[%s574_s16] sm:$0xff]  }
 0xa5b   : > { %v1365_v23 = vpack.c.bf16 %v1363_v22, %v1363_v22 }
 0xa5c   : > { %v2932_v24 = vpop.eup %2931 }
 0xa5d   : > { %v1364_v25 = vmul.f32 %v2932_v24, %v2928_v13  ;;  %2631 = vmatmul.mubr.msk.bf16.vlgmr.msra.gmra.mrb[16].mxu1 %vm792_vm3, %v1365_v23 }
 0xa5e   : > { %2642 = vmatprep.mubr.msk.bf16.mxu1 %vm3398_vm2, %v3397_v20 }
 0xa5f   : > { %v1366_v28 = vpack.c.bf16 %v1364_v25, %v1364_v25 }
 0xa60   : > { %2641 = vmatpush3.bf16.xpose.msra.mxu1 %v1471_v27 }
 0xa61   : > { %2637 = vmatmul.mubr.msk.bf16.vlgmr.msra.gmra.mrb[28].mxu0 %vm792_vm3, %v1366_v28  ;;  %2652 = vmatprep.subr.bf16.mxu1 %v3397_v20 }
 0xa62   : > { %2647 = vmatpush3.bf16.xpose.msra.mxu0 %v1521_v30  ;;  %2648 = vmatprep.mubr.msk.bf16.mxu0 %vm3398_vm2, %v3397_v20 }
 0xa63   : > { %2658 = vmatprep.subr.bf16.mxu0 %v3397_v20 }
 0xa67   : > { %2643 = vmatmul.mubr.msk.bf16.vlgmr.msra.gmra.mrb[20].mxu1 %vm792_vm3, %v1464_v32 }
 0xa68   : > { %2654 = vmatprep.mubr.msk.bf16.mxu1 %vm3398_vm2, %v3397_v20 }
 0xa69   : > { %2649 = vmatmul.mubr.msk.bf16.vlgmr.msra.gmra.mrb[32].mxu0 %vm792_vm3, %v1514_v33 }
 0xa6a   : > { %2660 = vmatprep.mubr.msk.bf16.mxu0 %vm3398_vm2, %v3397_v20 }
 0xb30   : > { %v1409_v34 = vpop.f32.mrb[16].mxu1 }
 0xb31   : > { %v2632_v35 = vpop.f32.mrb[17].mxu1 }
 0xb32   : > { %v1412_v36 = vpop.f32.mrb[18].mxu1 }
 0xb33   : > { %v2633_v38 = vpop.f32.mrb[19].mxu1 }
 0xb34   : > { %v1457_v39 = vpop.f32.mrb[28].mxu0 }
 0xb35   : > { %v2881_v40 = vpack.i.bf16 %v1457_v39, %v1409_v34  ;;  %v2638_v44 = vpop.f32.mrb[29].mxu0 }
 0xb36   : > { %v1460_v45 = vpop.f32.mrb[30].mxu0 }
 0xb37   : > { %v2639_v46 = vpop.f32.mrb[31].mxu0 }
 0xb3a   : > { %v1507_v48 = vpop.f32.mrb[20].mxu1 }
 0xb3b   : > { %v1563_v49 = vmul.f32 0.35355338, %v1507_v48  ;;  %v2644_v51 = vpop.f32.mrb[21].mxu1 }
 0xb3c   : > { %v1510_v52 = vpop.f32.mrb[22].mxu1  ;;  %v1557_v54 = vpop.f32.mrb[32].mxu0 }
 0xb3d   : > { %v1564_v55 = vmul.f32 0.35355338, %v1557_v54  ;;  %v2645_v56 = vpop.f32.mrb[23].mxu1  ;;  %v2650_v57 = vpop.f32.mrb[33].mxu0  ;;  %v1565_v58 = vsel %vm3990_vm4, %v1563_v49, -1e+30 }
 0xb3e   : > { %v1560_v59 = vpop.f32.mrb[34].mxu0  ;;  %v1567_v61 = vsel %vm792_vm3, %v1565_v58, -inf  ;;  %v1726_v56 = vsub.s32 4, %v3957_v29 }
 0xb3f   : > { %1568 = vmax.xlane.f32.xlu0 %v1567_v61  ;;  %v2651_v62 = vpop.f32.mrb[35].mxu0  ;;  %v1566_v63 = vsel %vm3990_vm4, %v1564_v55, -1e+30 }
 0xb40   : > { %v1570_v0 = vsel %vm792_vm3, %v1566_v63, -inf  ;;  %v1727_v57 = vrot.slane %v3961_v31, %v1726_v56 }
 0xb41   : > { %1571 = vmax.xlane.f32.xlu1 %v1570_v0 }
 0xb52   : > { %1639 = vrot.lane.b32.xlu1 %v3973_v53, %s3409_s3 }
 0xb56   : > { %2877 = vrot.lane.b32.xlu1 %v2876_v42, %s3410_s26 }
 0xb5a   : > { %2882 = vrot.lane.b32.xlu1 %v2881_v40, %s3411_s11 }
 0xbcc   : > { %v1569_v1 = vpop.xlane.xlu0 %1568 }
 0xbcd   : > { %v1573_v2 = vsub.f32 %v1565_v58, %v1569_v1 }
 0xbce   : > { %v1572_v3 = vpop.xlane.xlu1 %1571 }
 0xbcf   : > { %v1575_v4 = vmul.f32 1.442695, %v1573_v2  ;;  %v1574_v60 = vsub.f32 %v1566_v63, %v1572_v3 }
 0xbd1   : > { %2933 = vpow2.f32 %v1575_v4  ;;  %v1577_v7 = vmul.f32 1.442695, %v1574_v60 }
 0xbd2   : > { %v1640_v8 = vpop.permute.xlu1 %1639 }
 0xbd3   : > { %2935 = vpow2.f32 %v1577_v7  ;;  %v1645_v9 = vsel %vm923_vm5, %v1640_v8, 0 }
 0xbd4   : > { %2659 = vmatpush3.bf16.msra.mxu0 %v1645_v9 }
 0xbd5   : > { %2672 = vmatprep.subr.bf16.mxu0 %v3397_v20 }
 0xbd6   : > { %v2878_v33 = vpop.permute.xlu1 %2877 }
 0xbd7   : > { %v2880_v35 = vunpack.i.h.bf16 %v2878_v33  ;;  %v2879_v36 = vunpack.i.l.bf16 %v2878_v33  ;;  %v2899_v33 = vld [vmem:[%s3918_s28 + $0x10] sm:$0xff]  }
 0xbd9   : > { %v1712_v44 = vsel %vm792_vm3, %v4030_v47, %v2880_v35  ;;  %v1711_v45 = vsel %vm792_vm3, %v4028_v43, %v2879_v36  ;;  %v2901_v35 = vld [vmem:[%s3918_s28 + $0x20] sm:$0xff]   ;;  %v2902_v36 = vld [vmem:[%s3918_s28 + $0x28] sm:$0xff]  }
 0xbda   : > { %v2883_v34 = vpop.permute.xlu1 %2882 }
 0xbdb   : > { %v2934_v53 = vpop.eup %2933  ;;  %v2885_v38 = vunpack.i.h.bf16 %v2883_v34  ;;  %v2884_v39 = vunpack.i.l.bf16 %v2883_v34  ;;  %v2900_v34 = vld [vmem:[%s3918_s28 + $0x18] sm:$0xff]  }
 0xbdc   : > { %v1579_v37 = vsel %vm792_vm3, %v2934_v53, 0.0 }
 0xbdd   : > { %v2936_v41 = vpop.eup %2935  ;;  %1580 = vadd.xlane.f32.xlu0 %v1579_v37  ;;  %v1714_v49 = vsel %vm1713_vm6, %v1711_v45, %v2884_v39  ;;  %v1715_v51 = vsel %vm1713_vm6, %v1712_v44, %v2885_v38  ;;  %v2903_v38 = vld [vmem:[%s3918_s28 + $0x30] sm:$0xff]   ;;  %v2904_v39 = vld [vmem:[%s3918_s28 + $0x38] sm:$0xff]  }
 0xbde   : > { %v1582_v42 = vsel %vm792_vm3, %v2936_v41, 0.0 }
 0xbe1   : > { %1583 = vadd.xlane.f32.xlu0 %v1582_v42  ;;  %v2896_v42 = vld [vmem:[%s583_s17 + $0x8] sm:$0xff]  }
 0xbf7   : > { %1591 = vrot.lane.b32.xlu0 %v3971_v50, %s3409_s3 }
 0xc6a   : > { %v1581_v10 = vpop.xlane.xlu0 %1580 }
 0xc6b   : > { %2937 = vrcp.f32 %v1581_v10 }
 0xc6e   : > { %v1584_v11 = vpop.xlane.xlu0 %1583 }
 0xc6f   : > { %2939 = vrcp.f32 %v1584_v11 }
 0xc72   : > { %v1592_v12 = vpop.permute.xlu0 %1591 }
 0xc73   : > { %v1597_v13 = vsel %vm923_vm5, %v1592_v12, 0 }
 0xc74   : > { %2653 = vmatpush3.bf16.msra.mxu1 %v1597_v13 }
 0xc75   : > { %v2938_v14 = vpop.eup %2937  ;;  %2664 = vmatprep.subr.bf16.mxu1 %v3397_v20 }
 0xc76   : > { %v1587_v15 = vmul.f32 %v2938_v14, %v2934_v53 }
 0xc78   : > { %v1589_v16 = vpack.c.bf16 %v1587_v15, %v1587_v15 }
 0xc79   : > { %v2940_v17 = vpop.eup %2939 }
 0xc7a   : > { %v1588_v18 = vmul.f32 %v2940_v17, %v2936_v41  ;;  %2655 = vmatmul.mubr.msk.bf16.vlgmr.msra.gmra.mrb[24].mxu1 %vm792_vm3, %v1589_v16  ;;  %v2895_v41 = vld [vmem:[%s583_s17] sm:$0xff]   ;;  %v1814_v16 = vsub.s32 2, %v3957_v29 }
 0xc7b   : > { %2668 = vmatprep.mubr.msk.bf16.mxu1 %vm3398_vm2, %v3397_v20  ;;  %2665 = vmatpush3.bf16.msra.mxu1 %v2893_v19  ;;  %v1820_v19 = vsub.s32 3, %v3957_v29 }
 0xc7c   : > { %v1590_v50 = vpack.c.bf16 %v1588_v18, %v1588_v18  ;;  %2666 = vmatprep.subr.bf16.mxu1 %v3397_v20  ;;  %v1815_v18 = vrot.slane %v3961_v31, %v1814_v16 }
 0xc7e   : > { %2661 = vmatmul.mubr.msk.bf16.vlgmr.msra.gmra.mrb[36].mxu0 %vm792_vm3, %v1590_v50 }
 0xc7f   : > { %2676 = vmatprep.mubr.msk.bf16.mxu0 %vm3398_vm2, %v3397_v20  ;;  %2667 = vmatpush3.bf16.msra.mxu1 %v2894_v21 }
 0xc80   : > { %2680 = vmatprep.subr.bf16.mxu1 %v3397_v20  ;;  %2673 = vmatpush3.bf16.msra.mxu0 %v2895_v41  ;;  %v2023_v41 = vld [vmem:[#allocation8] sm:$0xff] (!%p2493_p5) }
 0xc81   : > { %2674 = vmatprep.subr.bf16.mxu0 %v3397_v20 }
 0xc84   : > { %2675 = vmatpush3.bf16.msra.mxu0 %v2896_v42  ;;  %v3413_v42 = vmov (!%p2493_p5), 0  }
 0xc85   : > { %2953 = vset.pattern.permute.xlu0 (!%p2493_p5), %v3413_v42 }
 0xd4d   : > { %v1633_v22 = vpop.f32.mrb[24].mxu1 }
 0xd4e   : > { %v2656_v23 = vpop.f32.mrb[25].mxu1 }
 0xd4f   : > { %v1636_v24 = vpop.f32.mrb[26].mxu1 }
 0xd50   : > { %v2657_v25 = vpop.f32.mrb[27].mxu1  ;;  %v1821_v24 = vrot.slane %v3961_v31, %v1820_v19 }
 0xd51   : > { %v1681_v26 = vpop.f32.mrb[36].mxu0 }
 0xd52   : > { %v2886_v27 = vpack.i.bf16 %v1681_v26, %v1633_v22  ;;  %v2662_v28 = vpop.f32.mrb[37].mxu0 }
 0xd53   : > { %v1684_v30 = vpop.f32.mrb[38].mxu0 }
 0xd54   : > { %2887 = vrot.lane.b32.xlu0 %v2886_v27, %s3412_s24  ;;  %v2663_v32 = vpop.f32.mrb[39].mxu0  ;;  %v2897_v30 = vld [vmem:[%s3918_s28] sm:$0xff]  }
 0xd55   : > { %v2898_v32 = vld [vmem:[%s3918_s28 + $0x8] sm:$0xff]  }
 0xdc6   : > { %v2888_v40 = vpop.permute.xlu0 %2887 }
 0xdc7   : > { %v2890_v46 = vunpack.i.h.bf16 %v2888_v40  ;;  %v2889_v48 = vunpack.i.l.bf16 %v2888_v40  ;;  %v1831_v40 = vsub.s32 7, %v3957_v29 }
 0xdc9   : > { %v1718_v52 = vsel %vm1716_vm7, %v1715_v51, %v2890_v46  ;;  %v1717_v54 = vsel %vm1716_vm7, %v1714_v49, %v2889_v48  ;;  %v1832_v44 = vrot.slane %v3961_v31, %v1831_v40 }
 0xdca   : > { %v1719_v55 = vpack.c.bf16 %v1718_v52, %v1717_v54 }
 0xdcc   : > { %2669 = vmatmul.mubr.msk.bf16.vlgmr.msra.gmra.mrb[28].mxu1 %vm677_vm1, %v1719_v55 }
 0xdcd   : > { %2696 = vmatprep.mubr.msk.bf16.mxu1 %vm3398_vm2, %v3397_v20  ;;  %2681 = vmatpush3.bf16.msra.mxu1 %v2897_v30 }
 0xdce   : > { %2682 = vmatprep.subr.bf16.mxu1 %v3397_v20 }
 0xdd1   : > { %2683 = vmatpush3.bf16.msra.mxu1 %v2898_v32 }
 0xdd2   : > { %2684 = vmatprep.subr.bf16.mxu1 %v3397_v20 }
 0xdd5   : > { %2685 = vmatpush3.bf16.msra.mxu1 %v2899_v33 }
 0xdd6   : > { %2686 = vmatprep.subr.bf16.mxu1 %v3397_v20 }
 0xdd9   : > { %2687 = vmatpush3.bf16.msra.mxu1 %v2900_v34 }
 0xdda   : > { %2688 = vmatprep.subr.bf16.mxu1 %v3397_v20 }
 0xddd   : > { %2689 = vmatpush3.bf16.msra.mxu1 %v2901_v35 }
 0xdde   : > { %2690 = vmatprep.subr.bf16.mxu1 %v3397_v20 }
 0xde1   : > { %2691 = vmatpush3.bf16.msra.mxu1 %v2902_v36 }
 0xde2   : > { %2692 = vmatprep.subr.bf16.mxu1 %v3397_v20 }
 0xde5   : > { %2693 = vmatpush3.bf16.msra.mxu1 %v2903_v38 }
 0xde6   : > { %2694 = vmatprep.subr.bf16.mxu1 %v3397_v20 }
 0xde9   : > { %2695 = vmatpush3.bf16.msra.mxu1 %v2904_v39 }
 0xe9f   : > { %v1777_v47 = vpop.f32.mrb[28].mxu1 }
 0xea0   : > { %v1778_v58 = vadd.f32 %v1777_v47, %v1727_v57  ;;  %v2670_v59 = vpop.f32.mrb[29].mxu1 }
 0xea1   : > { %v1780_v43 = vpop.f32.mrb[30].mxu1 }
 0xea2   : > { %v4146_v61 = vadd.f32 %v1778_v58, %v3933_v5  ;;  %v1781_v62 = vadd.f32 %v1780_v43, %v1727_v57  ;;  %v2671_v63 = vpop.f32.mrb[31].mxu1 }
 0xea4   : > { %v4149_v0 = vadd.f32 %v1781_v62, %v3935_v6  ;;  %v1786_v1 = vsel %vm677_vm1, %v4146_v61, 0.0 }
 0xea5   : > { %1787 = vadd.xlane.f32.xlu1 %v1786_v1 }
 0xea6   : > { %v1789_v2 = vsel %vm677_vm1, %v4149_v0, 0.0 }
 0xea7   : > { %1790 = vadd.xlane.f32.xlu0 %v1789_v2 }
 0xf32   : > { %v1788_v3 = vpop.xlane.xlu1 %1787 }
 0xf33   : > { %v1792_v4 = vmul.f32 0.03125, %v1788_v3  ;;  %v1924_v3 = vsub.s32 5, %v3957_v29 }
 0xf34   : > { %v1791_v60 = vpop.xlane.xlu0 %1790 }
 0xf35   : > { %v1794_v5 = vsub.f32 %v4146_v61, %v1792_v4  ;;  %v1793_v7 = vmul.f32 0.03125, %v1791_v60  ;;  %v1925_v4 = vrot.slane %v3961_v31, %v1924_v3  ;;  %v2024_v31 = vld [vmem:[#allocation8 + $0x8] sm:$0xff] (!%p2493_p5) }
 0xf37   : > { %v1795_v8 = vsub.f32 %v4149_v0, %v1793_v7  ;;  %v1796_v6 = vmul.f32 %v1794_v5, %v1794_v5 }
 0xf39   : > { %v1798_v9 = vsel %vm677_vm1, %v1796_v6, 0.0  ;;  %v1797_v53 = vmul.f32 %v1795_v8, %v1795_v8 }
 0xf3a   : > { %1799 = vadd.xlane.f32.xlu0 %v1798_v9 }
 0xf3b   : > { %v1801_v37 = vsel %vm677_vm1, %v1797_v53, 0.0 }
 0xf3e   : > { %1802 = vadd.xlane.f32.xlu0 %v1801_v37 }
 0xf54   : > { %2027 = vperm.xlu0 (!%p2493_p5), %2953, %v2023_v41  }
 0xf58   : > { %2032 = vperm.xlu0 (!%p2493_p5), %2953, %v2024_v31  }
 0xfc7   : > { %v1800_v10 = vpop.xlane.xlu0 %1799 }
 0xfc8   : > { %v1804_v11 = vmul.f32 0.03125, %v1800_v10 }
 0xfca   : > { %v1806_v12 = vadd.f32 1e-05, %v1804_v11 }
 0xfcb   : > { %v1803_v13 = vpop.xlane.xlu0 %1802 }
 0xfcc   : > { %2941 = vrsqrt.f32 %v1806_v12  ;;  %v1805_v14 = vmul.f32 0.03125, %v1803_v13 }
 0xfce   : > { %v1807_v15 = vadd.f32 1e-05, %v1805_v14 }
 0xfd0   : > { %2943 = vrsqrt.f32 %v1807_v15 }
 0xfd3   : > { %v2028_v10 = vpop.permute.xlu0 (!%p2493_p5), %2027 }
 0xfd6   : > { %v2942_v17 = vpop.eup %2941 }
 0xfd7   : > { %v1810_v50 = vmul.f32 %v2942_v17, %v1794_v5  ;;  %v2033_v13 = vpop.permute.xlu0 (!%p2493_p5), %2032 }
 0xfd9   : > { %v1816_v22 = vmul.f32 %v1815_v18, %v1810_v50 }
 0xfda   : > { %v2944_v21 = vpop.eup %2943 }
 0xfdb   : > { %v1811_v23 = vmul.f32 %v2944_v21, %v1795_v8  ;;  %v1822_v26 = vadd.f32 %v1821_v24, %v1816_v22 }
 0xfdd   : > { %v1817_v25 = vmul.f32 %v1815_v18, %v1811_v23 }
 0xfdf   : > { %v1823_v27 = vadd.f32 %v1821_v24, %v1817_v25 }
 0xfe1   : > { %v1824_v28 = vpack.c.bf16 %v1823_v27, %v1822_v26 }
 0xfe3   : > { %2677 = vmatmul.mubr.msk.bf16.vlgmr.msra.gmra.mrb[40].mxu0 %vm677_vm1, %v1824_v28 }
0x10b6   : > { %v1882_v45 = vpop.f32.mrb[40].mxu0 }
0x10b7   : > { %v1883_v46 = vadd.f32 %v1882_v45, %v1832_v44  ;;  %v2678_v48 = vpop.f32.mrb[41].mxu0  ;;  %v3414_v45 = vmov (!%p2493_p5), 0.0  }
0x10b8   : > { %v1885_v49 = vpop.f32.mrb[42].mxu0  ;;  %2700 = vmatprep.subr.bf16.mxu0 (!%p2493_p5), %v3414_v45  ;;  %2704 = vmatprep.mubr.msk.bf16.mxu0 (!%p2493_p5), %vm3415_vm10, %v3414_v45 }
0x10b9   : > { %v2483_v51 = vmul.f32 -1.702, %v1883_v46  ;;  %v1886_v52 = vadd.f32 %v1885_v49, %v1832_v44  ;;  %v2679_v54 = vpop.f32.mrb[43].mxu0  ;;  %v2954_v44 = vld [vmem:[#allocation20] sm:$0xff] (!%p2493_p5)  }
0x10ba   : > { %2701 = vmatpush3.bf16.msra.mxu0 (!%p2493_p5), %v2954_v44  ;;  %v2494_v54 = vld [vmem:[#allocation17] ss:$0 sm:$0xff] (!%p2493_p5) }
0x10bb   : > { %v1893_v55 = vmul.f32 1.442695, %v2483_v51  ;;  %v2484_v56 = vmul.f32 -1.702, %v1886_v52  ;;  %2702 = vmatprep.subr.bf16.mxu0 (!%p2493_p5), %v3414_v45 }
0x10bd   : > { %2945 = vpow2.f32 %v1893_v55  ;;  %v1895_v57 = vmul.f32 1.442695, %v2484_v56 }
0x10bf   : > { %2947 = vpow2.f32 %v1895_v57  ;;  %v2495_v57 = vld [vmem:[#allocation18] ss:$0 sm:$0xff] (!%p2493_p5) }
0x10c7   : > { %v2946_v47 = vpop.eup %2945 }
0x10c8   : > { %v1897_v20 = vadd.f32 1.0, %v2946_v47 }
0x10c9   : > { %v2948_v58 = vpop.eup %2947 }
0x10ca   : > { %2949 = vrcp.f32 %v1897_v20  ;;  %v1898_v59 = vadd.f32 1.0, %v2948_v58 }
0x10cc   : > { %2951 = vrcp.f32 %v1898_v59 }
0x10d4   : > { %v2950_v43 = vpop.eup %2949 }
0x10d5   : > { %v1903_v63 = vmul.f32 %v2950_v43, %v1883_v46  ;;  %v2955_v46 = vld [vmem:[#allocation20 + $0x8] sm:$0xff] (!%p2493_p5)  }
0x10d6   : > { %v2952_v62 = vpop.eup %2951  ;;  %2703 = vmatpush3.bf16.msra.mxu0 (!%p2493_p5), %v2955_v46 }
0x10d7   : > { %v1904_v1 = vmul.f32 %v2952_v62, %v1886_v52 }
0x10d9   : > { %v1905_v2 = vpack.c.bf16 %v1904_v1, %v1903_v63 }
0x10db   : > { %2697 = vmatmul.mubr.bf16.vlgmr.msra.gmra.mrb[32].mxu1 %v1905_v2 }
0x11ae   : > { %v2008_v60 = vpop.f32.mrb[32].mxu1 }
0x11af   : > { %v2009_v5 = vadd.f32 %v2008_v60, %v1925_v4  ;;  %v2698_v7 = vpop.f32.mrb[33].mxu1  ;;  %2022 = sbr.rel (%p2493_p5) target bundleno = 5097 (0x13e9), region = 116 }
0x11b0   : > { %v2011_v8 = vpop.f32.mrb[34].mxu1 }
0x11b1   : > { %v2015_v6 = vadd.f32 %v2009_v5, %v4146_v61  ;;  %v2012_v9 = vadd.f32 %v2011_v8, %v1925_v4  ;;  %v2699_v53 = vpop.f32.mrb[35].mxu1  ;;  %v3416_v5 = vmov (!%p2493_p5), 1966171168  }
0x11b2   : > { %v2174_v7 = vunpack.c.l.s4 (!%p2493_p5), %v3416_v5 }
0x11b3   : > { %2017 = vst.msk [vmem:[#allocation2] sm:$0xff] %vm677_vm1, %v2015_v6  ;;  %v2016_v37 = vadd.f32 %v2012_v9, %v4149_v0  ;;  %v2035_v11 = vmul.f32 (!%p2493_p5), %v2028_v10, %v2015_v6 }
0x11b4   : > { %v2175_v8 = vunpack.c.0.s8 (!%p2493_p5), %v2174_v7 }
0x11b5   : > { %2018 = vst.msk [vmem:[#allocation2 + $0x8] sm:$0xff] %vm677_vm1, %v2016_v37  ;;  %v2037_v61 = vsel (!%p2493_p5), %vm677_vm1, %v2035_v11, 0.0  ;;  %v2036_v14 = vmul.f32 (!%p2493_p5), %v2033_v13, %v2016_v37 }
0x11b6   : > { %v2038_v12 = vrot.slane %v2037_v61, 4  ;;  %v2178_v6 = vsub.s32 %v2175_v8, %v3957_v29 }
0x11b7   : > { %v2044_v0 = vsel %vm677_vm1, %v2036_v14, 0.0 }
0x11b8   : > { %v2039_v15 = vadd.f32 %v2038_v12, %v2037_v61  ;;  %v2045_v17 = vrot.slane %v2044_v0, 4 }
0x11ba   : > { %v2040_v16 = vrot.slane %v2039_v15, 2  ;;  %v2046_v50 = vadd.f32 %v2045_v17, %v2044_v0 }
0x11bc   : > { %v2041_v18 = vadd.f32 %v2040_v16, %v2039_v15  ;;  %v2047_v19 = vrot.slane %v2046_v50, 2 }
0x11be   : > { %v2042_v21 = vrot.slane %v2041_v18, 1  ;;  %v2048_v22 = vadd.f32 %v2047_v19, %v2046_v50 }
0x11c0   : > { %v2049_v23 = vrot.slane %v2048_v22, 1  ;;  %v2043_v24 = vadd.f32 %v2042_v21, %v2041_v18 }
0x11c2   : > { %v2050_v25 = vadd.f32 %v2049_v23, %v2048_v22 }
0x11c4   : > { %v2056_v26 = vsel %vm2055_vm8, %v2050_v25, %v2043_v24 }
0x11c5   : > { %v2059_v27 = vsel %vm2058_vm9, %v2056_v26, 0.0 }
0x11c6   : > { %2060 = vadd.xlane.f32.xlu1 %v2059_v27 }
0x1253   : > { %v2061_v28 = vpop.xlane.xlu1 %2060 }
0x1254   : > { %v2062_v30 = vmul.f32 0.03125, %v2061_v28 }
0x1256   : > { %v2064_v32 = vrot.slane %v2062_v30, 1  ;;  %v2067_v33 = vsub.f32 %v2043_v24, %v2062_v30 }
0x1258   : > { %v2068_v34 = vsub.f32 %v2050_v25, %v2064_v32  ;;  %v2069_v36 = vmul.f32 %v2067_v33, %v2067_v33 }
0x125a   : > { %v2070_v35 = vmul.f32 %v2068_v34, %v2068_v34 }
0x125c   : > { %v2073_v38 = vrot.slane %v2070_v35, 7 }
0x125e   : > { %v2074_v39 = vsel %vm2055_vm8, %v2073_v38, %v2069_v36 }
0x125f   : > { %v2076_v40 = vsel %vm2058_vm9, %v2074_v39, 0.0 }
0x1260   : > { %2077 = vadd.xlane.f32.xlu1 %v2076_v40 }
0x12ed   : > { %v2078_v48 = vpop.xlane.xlu1 %2077 }
0x12ee   : > { %v2079_v49 = vmul.f32 0.03125, %v2078_v48 }
0x12f0   : > { %v2080_v51 = vadd.f32 1e-05, %v2079_v49 }
0x12f2   : > { %2956 = vrsqrt.f32 %v2080_v51 }
0x12fc   : > { %v2957_v52 = vpop.eup %2956 }
0x12fd   : > { %v2083_v55 = vrot.slane %v2957_v52, 1  ;;  %v2086_v56 = vmul.f32 %v2957_v52, %v2067_v33 }
0x12ff   : > { %v2087_v47 = vmul.f32 %v2083_v55, %v2068_v34  ;;  %v2094_v20 = vmul.f32 %v2494_v54, %v2086_v56 }
0x1301   : > { %v2095_v58 = vmul.f32 %v2494_v54, %v2087_v47  ;;  %v2102_v59 = vadd.f32 %v2495_v57, %v2094_v20 }
0x1303   : > { %v2103_v43 = vadd.f32 %v2495_v57, %v2095_v58  ;;  %v2104_v62 = vpack.c.bf16 %v2102_v59, %v2102_v59 }
0x1305   : > { %v2105_v63 = vpack.c.bf16 %v2103_v43, %v2103_v43  ;;  %v2112_v2 = vunpack.c.l.b16 %v2104_v62 }
0x1307   : > { %v2113_v1 = vunpack.c.l.b16 %v2105_v63 }
0x1309   : > { %v2114_v3 = vrot.slane %v2113_v1, 7 }
0x130b   : > { %v2115_v4 = vsel %vm2055_vm8, %v2114_v3, %v2112_v2 }
0x130c   : > { %v2116_v60 = vpack.c.b16 %v2115_v4, %v2115_v4 }
0x130e   : > { %2705 = vmatmul.mubr.msk.bf16.vlgmr.msra.gmra.mrb[0].mxu0 %vm677_vm1, %v2116_v60 }
0x13e1   : > { %v2166_v9 = vpop.f32.mrb[0].mxu0 }
0x13e2   : > { %v2179_v53 = vrot.slane %v2166_v9, %v2178_v6  ;;  %v2706_v37 = vpop.f32.mrb[1].mxu0 }
0x13e3   : > { %v2169_v41 = vpop.f32.mrb[2].mxu0 }
0x13e4   : > { %v2180_v42 = vcombine.high %v2179_v53, %v2179_v53  ;;  %v2187_v31 = vrot.slane %v2179_v53, %v2178_v6  ;;  %v2707_v10 = vpop.f32.mrb[3].mxu0 }
0x13e6   : > { %v2194_v11 = vrot.slane %v2180_v42, %v2178_v6  ;;  %2198 = vst.msk [vmem:[#allocation21] sm:$0x1] %vm2197_vm11, %v2187_v31 }
0x13e8   : > { %2199 = vst.msk [vmem:[#allocation21 + $0x1] sm:$0x1] %vm2197_vm11, %v2194_v11 }
0x13e9 PF: > { %p2794_p8 = scmp.eq.s32.totalorder %s3510_s25, 1  ;;  %s3417_s9 = smov [#allocation21]  }
0x13ea   : > { %s2209_s27 = sshll.u32 %s3417_s9, 4  ;;  %s2210_s27 = int_to_ptr.vmem [resolvable:$true] %s2209_s27 }
0x13eb   : > { %s3276_s16 = scalar_lea.vmem %s2210_s27, 32  ;;  %p3283_p10 = scmp.lt.s32.totalorder %s2210_s27, %s2210_s27 }
0x13ec   : > { %p3277_p3 = scmp.ne.s32.totalorder %s2210_s27, %s3276_s16  ;;  %p3284_p11 = scmp.lt.s32.totalorder %s3276_s16, %s3276_s16 }
0x13ee   : > { %p3278_p0 = pnand %p3277_p3, %p2794_p8  ;;  %p3285_p13 = por %p3284_p11, %p3283_p10 }
0x13f0   : > { %p3279_p7 = pneg %p3278_p0 }
0x13f2   : > { %p3286_p12 = pnand %p3285_p13, %p3279_p7 }
0x13f4   : > { %3289 = shalt.err (!%p3286_p12)
}
0x13f5   : > { %s4332_s22 = sld [smem:[#allocation43_spill]] }
0x13fb   : > { %s4333_s28 = smov %s4332_s22  ;;  %s3290_s15 = scalar_lea.hbm %s4332_s22, 32 }
0x13fc   : > { %p3291_p4 = scmp.ne.s32.totalorder %s4333_s28, %s3290_s15  ;;  %p3296_p1 = scmp.lt.u32.totalorder %s3290_s15, %s4333_s28 }
0x13fe   : > { %p3292_p2 = pnand %p3291_p4, %p2794_p8 }
0x1400   : > { %p3293_p9 = pneg %p3292_p2 }
0x1402   : > { %p3298_p6 = pnand %p3296_p1, %p3293_p9 }
0x1404   : > { %3301 = shalt.err (!%p3298_p6)
}
0x1405   : > { %s3418_s13 = smov 1  }
0x1406   : > { %2743 = dma.vmem_to_hbm [thread:$0]  (%p2794_p8), %s2210_s27, 32, %s4333_s28, [#allocation5], %s3411_s11, %s3411_s11, %s3418_s13  }
0x1407   : > { %3355 = dma.done.wait (%p2794_p8), [#allocation5], 32  }
0x1408   : > { %3357 = vsyncadd (%p2794_p8), [#allocation5], 4294967264 }
0x1409 PF: > { %s4334_s8 = sld [smem:[#allocation33_spill]]  ;;  %s4335_s17 = sld [smem:[#allocation30_spill]] }
0x140a   : > { %s4336_s18 = sld [smem:[#allocation31_spill]]  ;;  %s4337_s19 = sld [smem:[#allocation37_spill]] }
0x140b   : > { %s4338_s29 = sld [smem:[#allocation35_spill]]  ;;  %s4339_s20 = smov %s3376_s21 }
0x140f   : > { %s34_s22 = sadd.s32 1, %s4334_s8  }
0x1410   : > { %p31_p5 = scmp.ge.s32.totalorder %s34_s22, 4  }
0x1411   : > { %s4340_s21 = smov %s4338_s29 }
0x1412   :  { %33 = sbr.rel (!%p31_p5) target bundleno = 19 (0x13), region = 185 }
0x1419   :  { %2225 = vsyncpa [#allocation4], 1 }
0x141a   :  { %2227 = vsyncpa [#allocation4 + $0x1], 1 }
0x141b   :  { %2228 = vsyncpa [#allocation7], 1 }
0x141c   :  { %2229 = vsyncpa [#allocation10], 1 }
0x141d   :  { %2231 = vsyncpa [#allocation10 + $0x1], 1 }
0x141e   :  { %2232 = vsyncpa [#allocation13], 1 }
0x141f   :  { %2234 = vsyncpa [#allocation13 + $0x1], 1 }
0x1420   :  { %2235 = vsyncpa [#allocation16], 1 }
0x1421   :  { %2237 = vsyncpa [#allocation16 + $0x1], 1 }
0x1422   :  { %2238 = vsyncpa [#allocation19], 1 }
0x1423   :  { %2239 = vsyncpa [#allocation5], 1 }
0x1424   :  { %2241 = vsyncpa [#allocation5 + $0x1], 1 }

</bundles_post_ra>
